<compile_context>
chip_gen: v6e
topology: v6e:2x2x1
jax: 0.10.0
libtpu: 0.0.40
codegen_flags: <defaults>
</compile_context>

<pallas_src>
import math

import jax
import jax.numpy as jnp
from jax.experimental import pallas as pl
from jax.experimental.pallas import tpu as pltpu

# Hyper-parameters matching ParallelEncoder.__init__ (small demo sizes).
NUM_LAYERS = 4
NUM_FILTERS = 8      # n_filters
NUM_ENCODERS = 2     # n_encoders
OBS_C, OBS_H, OBS_W = 4, 20, 20   # obs_shape
BATCH = 2


def _round_up(x, m):
    return (x + m - 1) // m * m


def _make_kernel(EF, Cp, Wp):
    """Single-invocation kernel: all encoders / batches / layers in one body."""

    taps = [(ky, kx) for ky in range(3) for kx in range(3)]

    def shift(v, off):
        # result[:, i] = v[:, (i + off) % NP]  (jnp.roll semantics: shift=NP-off).
        # Wrapped lanes only land in garbage border positions never read by a
        # valid output (flat-canvas scheme; validated by the wrapper asserts).
        if off == 0:
            return v
        return pltpu.roll(v, v.shape[1] - off, axis=1)

    def kernel(obs_ref, w_ref, b_ref, out_ref, cols_ref):
        # obs_ref : (2, 2, Cp, NP) f32  raw phase-split obs (0..255), zero padded
        # w_ref   : (4, EF, 9*EF)  bf16 layer-stacked weights
        #            (layer 0: normalization folded + channels padded;
        #             layers 1-3: block-diagonal over encoders)
        # b_ref   : (4, EF, 1)     f32  layer-stacked biases (layer 0: folded)
        # out_ref : (EF, NP)       f32  final flat canvas (row = e*F + f)
        # cols_ref: (9*EF, NP)     bf16 im2col scratch, reused by all 4 layers

        def fill_cols(get_tap, rows):
            # Store the 9 rolled taps straight into the shared cols scratch
            # (sublane offsets are multiples of 16 -> aligned bf16 stores).
            for t, (ky, kx) in enumerate(taps):
                cols_ref[t * rows:(t + 1) * rows, :] = (
                    get_tap(ky, kx).astype(jnp.bfloat16))

        def layer(l):
            # One MXU matmul per layer, bf16 operands, f32 accumulation;
            # bias-add / ReLU kept in f32.
            y = jnp.dot(w_ref[l], cols_ref[...],
                        preferred_element_type=jnp.float32)      # (EF, NP)
            return jnp.maximum(y + b_ref[l], 0.0)

        # Layer 0: stride-2 via the phase decomposition -> tap (ky,kx) reads
        # phase (ky%2, kx%2) shifted by (ky//2)*Wp + kx//2 on the flat canvas.
        phases = [[obs_ref[py, px] for px in range(2)] for py in range(2)]
        fill_cols(lambda ky, kx: shift(phases[ky % 2][kx % 2],
                                       (ky // 2) * Wp + kx // 2), Cp)
        x = layer(0)

        # Layers 1-3: unstrided taps are plain lane shifts of the stacked canvas.
        for l in range(1, 4):
            fill_cols(lambda ky, kx, x=x: shift(x, ky * Wp + kx), EF)
            x = layer(l)

        out_ref[...] = x

    return kernel


def pack_params(params):
    """One-time repack (hoist out of the per-call path).

    Returns:
      w: (4, E*F, 9*E*F) bf16 — layer 0 with /255 fold + channel pad,
                                 layers 1-3 block-diagonal over encoders.
      b: (4, E*F, 1)    f32  — layer 0 with the -0.5 normalization folded in.
    """
    E, _, _, C, F = params["w0"].shape
    EF = E * F
    Cp = max(_round_up(C, 16), 16)       # bf16 sublane-group aligned channel pad
    # Single shared cols-scratch layout requires 9*Cp == 9*EF.
    # TODO(synk): generalize to Cp != E*F by zero-padding weight columns and
    #             zero-initializing the scratch.
    assert Cp == EF, (Cp, EF)

    # ---- layer 0: fold obs/255 - 0.5 into weights/bias, pad cin, fuse taps ----
    w0 = params["w0"]                                          # (E,3,3,C,F)
    b0_eff = params["b0"][:, 0, :] - 0.5 * jnp.sum(w0, axis=(1, 2, 3))   # (E,F)
    w0s = jnp.pad(w0 / 255.0, ((0, 0), (0, 0), (0, 0), (0, Cp - C), (0, 0)))
    # rows = e*F + fout, columns = tap*Cp + cin
    w0m = jnp.transpose(w0s, (0, 4, 1, 2, 3)).reshape(EF, 9 * Cp)

    # ---- layers 1-3: block-diagonal (E*F, 9*E*F) over the stacked canvas ----
    def pack_hidden(w):                                        # (E,3,3,F,F)
        wt = jnp.transpose(w, (0, 4, 1, 2, 3)).reshape(E, F, 9, F)  # e,fo,t,ci
        blocks = []
        for e in range(E):
            blk = jnp.zeros((F, 9, EF), dtype=w.dtype)
            blk = blk.at[:, :, e * F:(e + 1) * F].set(wt[e])
            blocks.append(blk.reshape(F, 9 * EF))
        return jnp.concatenate(blocks, axis=0)                 # (EF, 9*EF)

    w_all = jnp.stack([w0m] + [pack_hidden(params[f"w{l}"]) for l in (1, 2, 3)])
    b_hid = [jnp.transpose(params[f"b{l}"], (0, 2, 1)).reshape(EF, 1)
             for l in (1, 2, 3)]
    b_all = jnp.stack([b0_eff.reshape(EF, 1)] + b_hid)

    return {"w": w_all.astype(jnp.bfloat16), "b": b_all.astype(jnp.float32)}


def parallel_encoder_forward(obs_nchw, packed,
                             n_filters=NUM_FILTERS, n_encoders=NUM_ENCODERS):
    B, C, H, W = obs_nchw.shape
    E, F = n_encoders, n_filters
    EF = E * F
    assert H % 2 == 0 and W % 2 == 0
    Hp, Wp = H // 2, W // 2
    H1, W1 = (H - 3) // 2 + 1, (W - 3) // 2 + 1     # after the stride-2 conv
    Hf, Wf = H1 - 6, W1 - 6                         # after 3 more VALID convs
    assert Hf >= 1 and Wf >= 1
    assert H1 <= Hp and W1 <= Wp                    # flat-canvas scheme validity

    Cp = max(_round_up(C, 16), 16)
    assert Cp == EF                                 # shared cols-scratch layout
    N = B * Hp * Wp                                 # flat canvas (batch on lanes)
    NP = _round_up(N, 128)                          # lane-pad -> full-lane vregs

    # ---- glue: NCHW -> phase split (space-to-depth), channels-on-sublanes ----
    x = obs_nchw.astype(jnp.float32).reshape(B, C, Hp, 2, Wp, 2)
    x = jnp.transpose(x, (3, 5, 1, 0, 2, 4))        # (py, px, c, b, hp, wp)
    x = x.reshape(2, 2, C, N)
    obs_ph = jnp.pad(x, ((0, 0), (0, 0), (0, Cp - C), (0, NP - N)))

    def full_spec(shape):
        zeros = (0,) * len(shape)
        return pl.BlockSpec(shape, lambda i: zeros)

    kernel = _make_kernel(EF, Cp, Wp)
    canvas = pl.pallas_call(
        kernel,
        out_shape=jax.ShapeDtypeStruct((EF, NP), jnp.float32),
        grid=(1,),                                  # single step: all-in-VMEM
        in_specs=[full_spec(obs_ph.shape),
                  full_spec(packed["w"].shape),
                  full_spec(packed["b"].shape)],
        out_specs=full_spec((EF, NP)),
        scratch_shapes=[pltpu.VMEM((9 * EF, NP), jnp.bfloat16)],
        compiler_params=pltpu.CompilerParams(
            dimension_semantics=("arbitrary",)),
    )(obs_ph, packed["w"], packed["b"])

    # ---- glue: crop valid region, NCHW-order flatten -> (E, B, F*Hf*Wf) ----
    v = canvas[:, :N].reshape(E, F, B, Hp, Wp)[:, :, :, :Hf, :Wf]
    return jnp.transpose(v, (0, 2, 1, 3, 4)).reshape(E, B, F * Hf * Wf)


def init_params(key):
    """Deterministic synthetic parameters (shapes from ParallelEncoder.__init__)."""
    cins = [OBS_C, NUM_FILTERS, NUM_FILTERS, NUM_FILTERS]
    keys = jax.random.split(key, 2 * NUM_LAYERS)
    params = {}
    for l in range(NUM_LAYERS):
        fan_in = cins[l] * 9
        params[f"w{l}"] = jax.random.normal(
            keys[2 * l], (NUM_ENCODERS, 3, 3, cins[l], NUM_FILTERS),
            dtype=jnp.float32) / math.sqrt(fan_in)
        params[f"b{l}"] = 0.05 * jax.random.normal(
            keys[2 * l + 1], (NUM_ENCODERS, 1, NUM_FILTERS), dtype=jnp.float32)
    return params


def reference_forward(obs_nchw, params):
    """Pure-JAX reference mirroring the PyTorch module (grouped convs, f32 HIGHEST)."""
    E, F = NUM_ENCODERS, NUM_FILTERS
    x = obs_nchw / 255.0 - 0.5
    x = jnp.tile(x, (1, E, 1, 1))
    strides = [(2, 2), (1, 1), (1, 1), (1, 1)]
    for l in range(NUM_LAYERS):
        w = params[f"w{l}"]                               # (E, 3, 3, Cin, F)
        b = params[f"b{l}"]                               # (E, 1, F)
        w_oihw = jnp.transpose(w, (0, 4, 3, 1, 2)).reshape(E * F, w.shape[3], 3, 3)
        x = jax.lax.conv_general_dilated(
            x, w_oihw, window_strides=strides[l], padding="VALID",
            dimension_numbers=("NCHW", "OIHW", "NCHW"),
            feature_group_count=E,
            precision=jax.lax.Precision.HIGHEST)
        x = jnp.maximum(x + b.reshape(1, E * F, 1, 1), 0.0)
    B = obs_nchw.shape[0]
    h = x.reshape(B, E, -1)
    return jnp.transpose(h, (1, 0, 2))


if __name__ == "__main__":
    key = jax.random.PRNGKey(0)
    k_obs, k_par = jax.random.split(key)
    obs = jax.random.uniform(k_obs, (BATCH, OBS_C, OBS_H, OBS_W),
                             minval=0.0, maxval=255.0, dtype=jnp.float32)
    params = init_params(k_par)

    packed = pack_params(params)          # one-time repack, off the call path
    fwd = jax.jit(parallel_encoder_forward)
    out = jax.block_until_ready(fwd(obs, packed))

    ref = jax.block_until_ready(reference_forward(obs, params))
    Hf = ((OBS_H - 3) // 2 + 1) - 6
    Wf = ((OBS_W - 3) // 2 + 1) - 6
    assert out.shape == (NUM_ENCODERS, BATCH, NUM_FILTERS * Hf * Wf), out.shape
    err = float(jnp.max(jnp.abs(out - ref)))
    # bf16 matmul operands with f32 accumulation: expected max-abs error well
    # below 1e-2 at these magnitudes (deliberate precision choice, see review).
    assert err < 2e-2, f"max abs error vs reference too large: {err}"

    print("KERNEL_OK")
</pallas_src>

<mosaic_0001>
module attributes {stable_mosaic.version = 11 : i64} {
  func.func @kernel(%arg0: i32, %arg1: memref<2x2x16x256xf32, #tpu.memory_space<vmem>>, %arg2: memref<4x16x144xbf16, #tpu.memory_space<vmem>>, %arg3: memref<4x16x1xf32, #tpu.memory_space<vmem>>, %arg4: memref<16x256xf32, #tpu.memory_space<vmem>>, %arg5: memref<144x256xbf16, #tpu.memory_space<vmem>>) attributes {dimension_semantics = [#tpu.dimension_semantics<arbitrary>], iteration_bounds = array<i64: 1>, scalar_prefetch = 0 : i64, scratch_operands = 1 : i64, tpu.core_type = #tpu.core_type<tc>, window_params = [{pipeline_mode = #tpu.pipeline_mode<synchronous>, transform_indices = @transform_0, window_bounds = array<i64: 2, 2, 16, 256>}, {pipeline_mode = #tpu.pipeline_mode<synchronous>, transform_indices = @transform_1, window_bounds = array<i64: 4, 16, 144>}, {pipeline_mode = #tpu.pipeline_mode<synchronous>, transform_indices = @transform_2, window_bounds = array<i64: 4, 16, 1>}, {pipeline_mode = #tpu.pipeline_mode<synchronous>, transform_indices = @transform_3, window_bounds = array<i64: 16, 256>}]} {
    %c0 = arith.constant 0 : index
    %c0_0 = arith.constant 0 : index
    %c0_1 = arith.constant 0 : index
    %c0_2 = arith.constant 0 : index
    %0 = vector.load %arg1[%c0, %c0_0, %c0_1, %c0_2] : memref<2x2x16x256xf32, #tpu.memory_space<vmem>>, vector<1x1x16x256xf32>
    %1 = vector.shape_cast %0 : vector<1x1x16x256xf32> to vector<16x256xf32>
    %c0_3 = arith.constant 0 : index
    %c1 = arith.constant 1 : index
    %c0_4 = arith.constant 0 : index
    %c0_5 = arith.constant 0 : index
    %2 = vector.load %arg1[%c0_3, %c1, %c0_4, %c0_5] : memref<2x2x16x256xf32, #tpu.memory_space<vmem>>, vector<1x1x16x256xf32>
    %3 = vector.shape_cast %2 : vector<1x1x16x256xf32> to vector<16x256xf32>
    %c1_6 = arith.constant 1 : index
    %c0_7 = arith.constant 0 : index
    %c0_8 = arith.constant 0 : index
    %c0_9 = arith.constant 0 : index
    %4 = vector.load %arg1[%c1_6, %c0_7, %c0_8, %c0_9] : memref<2x2x16x256xf32, #tpu.memory_space<vmem>>, vector<1x1x16x256xf32>
    %5 = vector.shape_cast %4 : vector<1x1x16x256xf32> to vector<16x256xf32>
    %c1_10 = arith.constant 1 : index
    %c1_11 = arith.constant 1 : index
    %c0_12 = arith.constant 0 : index
    %c0_13 = arith.constant 0 : index
    %6 = vector.load %arg1[%c1_10, %c1_11, %c0_12, %c0_13] : memref<2x2x16x256xf32, #tpu.memory_space<vmem>>, vector<1x1x16x256xf32>
    %7 = vector.shape_cast %6 : vector<1x1x16x256xf32> to vector<16x256xf32>
    %8 = arith.truncf %1 : vector<16x256xf32> to vector<16x256xbf16>
    %c0_14 = arith.constant 0 : index
    %c0_15 = arith.constant 0 : index
    %9 = vector.load %arg5[%c0_14, %c0_15] : memref<144x256xbf16, #tpu.memory_space<vmem>>, vector<16x256xbf16>
    tpu.vector_store %arg5[%c0_14, %c0_15], %8 {strides = array<i32>} : memref<144x256xbf16, #tpu.memory_space<vmem>>, vector<16x256xbf16>,
    %10 = arith.truncf %3 : vector<16x256xf32> to vector<16x256xbf16>
    %c16 = arith.constant 16 : index
    %c0_16 = arith.constant 0 : index
    %11 = vector.load %arg5[%c16, %c0_16] : memref<144x256xbf16, #tpu.memory_space<vmem>>, vector<16x256xbf16>
    tpu.vector_store %arg5[%c16, %c0_16], %10 {strides = array<i32>} : memref<144x256xbf16, #tpu.memory_space<vmem>>, vector<16x256xbf16>,
    %c255_i32 = arith.constant 255 : i32
    %12 = tpu.dynamic_rotate %1 by %c255_i32 dim 1 : vector<16x256xf32>, i32 -> vector<16x256xf32>
    %13 = arith.truncf %12 : vector<16x256xf32> to vector<16x256xbf16>
    %c32 = arith.constant 32 : index
    %c0_17 = arith.constant 0 : index
    %14 = vector.load %arg5[%c32, %c0_17] : memref<144x256xbf16, #tpu.memory_space<vmem>>, vector<16x256xbf16>
    tpu.vector_store %arg5[%c32, %c0_17], %13 {strides = array<i32>} : memref<144x256xbf16, #tpu.memory_space<vmem>>, vector<16x256xbf16>,
    %15 = arith.truncf %5 : vector<16x256xf32> to vector<16x256xbf16>
    %c48 = arith.constant 48 : index
    %c0_18 = arith.constant 0 : index
    %16 = vector.load %arg5[%c48, %c0_18] : memref<144x256xbf16, #tpu.memory_space<vmem>>, vector<16x256xbf16>
    tpu.vector_store %arg5[%c48, %c0_18], %15 {strides = array<i32>} : memref<144x256xbf16, #tpu.memory_space<vmem>>, vector<16x256xbf16>,
    %17 = arith.truncf %7 : vector<16x256xf32> to vector<16x256xbf16>
    %c64 = arith.constant 64 : index
    %c0_19 = arith.constant 0 : index
    %18 = vector.load %arg5[%c64, %c0_19] : memref<144x256xbf16, #tpu.memory_space<vmem>>, vector<16x256xbf16>
    tpu.vector_store %arg5[%c64, %c0_19], %17 {strides = array<i32>} : memref<144x256xbf16, #tpu.memory_space<vmem>>, vector<16x256xbf16>,
    %c255_i32_20 = arith.constant 255 : i32
    %19 = tpu.dynamic_rotate %5 by %c255_i32_20 dim 1 : vector<16x256xf32>, i32 -> vector<16x256xf32>
    %20 = arith.truncf %19 : vector<16x256xf32> to vector<16x256xbf16>
    %c80 = arith.constant 80 : index
    %c0_21 = arith.constant 0 : index
    %21 = vector.load %arg5[%c80, %c0_21] : memref<144x256xbf16, #tpu.memory_space<vmem>>, vector<16x256xbf16>
    tpu.vector_store %arg5[%c80, %c0_21], %20 {strides = array<i32>} : memref<144x256xbf16, #tpu.memory_space<vmem>>, vector<16x256xbf16>,
    %c246_i32 = arith.constant 246 : i32
    %22 = tpu.dynamic_rotate %1 by %c246_i32 dim 1 : vector<16x256xf32>, i32 -> vector<16x256xf32>
    %23 = arith.truncf %22 : vector<16x256xf32> to vector<16x256xbf16>
    %c96 = arith.constant 96 : index
    %c0_22 = arith.constant 0 : index
    %24 = vector.load %arg5[%c96, %c0_22] : memref<144x256xbf16, #tpu.memory_space<vmem>>, vector<16x256xbf16>
    tpu.vector_store %arg5[%c96, %c0_22], %23 {strides = array<i32>} : memref<144x256xbf16, #tpu.memory_space<vmem>>, vector<16x256xbf16>,
    %c246_i32_23 = arith.constant 246 : i32
    %25 = tpu.dynamic_rotate %3 by %c246_i32_23 dim 1 : vector<16x256xf32>, i32 -> vector<16x256xf32>
    %26 = arith.truncf %25 : vector<16x256xf32> to vector<16x256xbf16>
    %c112 = arith.constant 112 : index
    %c0_24 = arith.constant 0 : index
    %27 = vector.load %arg5[%c112, %c0_24] : memref<144x256xbf16, #tpu.memory_space<vmem>>, vector<16x256xbf16>
    tpu.vector_store %arg5[%c112, %c0_24], %26 {strides = array<i32>} : memref<144x256xbf16, #tpu.memory_space<vmem>>, vector<16x256xbf16>,
    %c245_i32 = arith.constant 245 : i32
    %28 = tpu.dynamic_rotate %1 by %c245_i32 dim 1 : vector<16x256xf32>, i32 -> vector<16x256xf32>
    %29 = arith.truncf %28 : vector<16x256xf32> to vector<16x256xbf16>
    %c128 = arith.constant 128 : index
    %c0_25 = arith.constant 0 : index
    %30 = vector.load %arg5[%c128, %c0_25] : memref<144x256xbf16, #tpu.memory_space<vmem>>, vector<16x256xbf16>
    tpu.vector_store %arg5[%c128, %c0_25], %29 {strides = array<i32>} : memref<144x256xbf16, #tpu.memory_space<vmem>>, vector<16x256xbf16>,
    %c0_26 = arith.constant 0 : index
    %c0_27 = arith.constant 0 : index
    %c0_28 = arith.constant 0 : index
    %31 = vector.load %arg2[%c0_26, %c0_27, %c0_28] : memref<4x16x144xbf16, #tpu.memory_space<vmem>>, vector<1x16x144xbf16>
    %32 = vector.shape_cast %31 : vector<1x16x144xbf16> to vector<16x144xbf16>
    %c0_29 = arith.constant 0 : index
    %c0_30 = arith.constant 0 : index
    %33 = vector.load %arg5[%c0_29, %c0_30] : memref<144x256xbf16, #tpu.memory_space<vmem>>, vector<144x256xbf16>
    %cst = arith.constant dense<0.000000e+00> : vector<16x256xf32>
    %34 = tpu.matmul %32, %33, %cst {dimension_numbers = #tpu.dot_dimension_numbers<[1], [0], [0], [1], [0, 0, 1, 1], [], []>} : vector<16x144xbf16>, vector<144x256xbf16>, vector<16x256xf32> -> vector<16x256xf32>
    %c0_31 = arith.constant 0 : index
    %c0_32 = arith.constant 0 : index
    %c0_33 = arith.constant 0 : index
    %35 = vector.load %arg3[%c0_31, %c0_32, %c0_33] : memref<4x16x1xf32, #tpu.memory_space<vmem>>, vector<1x16x1xf32>
    %36 = vector.shape_cast %35 : vector<1x16x1xf32> to vector<16x1xf32>
    %37 = vector.broadcast %36 : vector<16x1xf32> to vector<16x256xf32>
    %38 = arith.addf %34, %37 : vector<16x256xf32>
    %cst_34 = arith.constant 0.000000e+00 : f32
    %39 = vector.broadcast %cst_34 : f32 to vector<16x256xf32>
    %40 = arith.maximumf %38, %39 : vector<16x256xf32>
    %41 = arith.truncf %40 : vector<16x256xf32> to vector<16x256xbf16>
    %c0_35 = arith.constant 0 : index
    %c0_36 = arith.constant 0 : index
    %42 = vector.load %arg5[%c0_35, %c0_36] : memref<144x256xbf16, #tpu.memory_space<vmem>>, vector<16x256xbf16>
    tpu.vector_store %arg5[%c0_35, %c0_36], %41 {strides = array<i32>} : memref<144x256xbf16, #tpu.memory_space<vmem>>, vector<16x256xbf16>,
    %c255_i32_37 = arith.constant 255 : i32
    %43 = tpu.dynamic_rotate %40 by %c255_i32_37 dim 1 : vector<16x256xf32>, i32 -> vector<16x256xf32>
    %44 = arith.truncf %43 : vector<16x256xf32> to vector<16x256xbf16>
    %c16_38 = arith.constant 16 : index
    %c0_39 = arith.constant 0 : index
    %45 = vector.load %arg5[%c16_38, %c0_39] : memref<144x256xbf16, #tpu.memory_space<vmem>>, vector<16x256xbf16>
    tpu.vector_store %arg5[%c16_38, %c0_39], %44 {strides = array<i32>} : memref<144x256xbf16, #tpu.memory_space<vmem>>, vector<16x256xbf16>,
    %c254_i32 = arith.constant 254 : i32
    %46 = tpu.dynamic_rotate %40 by %c254_i32 dim 1 : vector<16x256xf32>, i32 -> vector<16x256xf32>
    %47 = arith.truncf %46 : vector<16x256xf32> to vector<16x256xbf16>
    %c32_40 = arith.constant 32 : index
    %c0_41 = arith.constant 0 : index
    %48 = vector.load %arg5[%c32_40, %c0_41] : memref<144x256xbf16, #tpu.memory_space<vmem>>, vector<16x256xbf16>
    tpu.vector_store %arg5[%c32_40, %c0_41], %47 {strides = array<i32>} : memref<144x256xbf16, #tpu.memory_space<vmem>>, vector<16x256xbf16>,
    %c246_i32_42 = arith.constant 246 : i32
    %49 = tpu.dynamic_rotate %40 by %c246_i32_42 dim 1 : vector<16x256xf32>, i32 -> vector<16x256xf32>
    %50 = arith.truncf %49 : vector<16x256xf32> to vector<16x256xbf16>
    %c48_43 = arith.constant 48 : index
    %c0_44 = arith.constant 0 : index
    %51 = vector.load %arg5[%c48_43, %c0_44] : memref<144x256xbf16, #tpu.memory_space<vmem>>, vector<16x256xbf16>
    tpu.vector_store %arg5[%c48_43, %c0_44], %50 {strides = array<i32>} : memref<144x256xbf16, #tpu.memory_space<vmem>>, vector<16x256xbf16>,
    %c245_i32_45 = arith.constant 245 : i32
    %52 = tpu.dynamic_rotate %40 by %c245_i32_45 dim 1 : vector<16x256xf32>, i32 -> vector<16x256xf32>
    %53 = arith.truncf %52 : vector<16x256xf32> to vector<16x256xbf16>
    %c64_46 = arith.constant 64 : index
    %c0_47 = arith.constant 0 : index
    %54 = vector.load %arg5[%c64_46, %c0_47] : memref<144x256xbf16, #tpu.memory_space<vmem>>, vector<16x256xbf16>
    tpu.vector_store %arg5[%c64_46, %c0_47], %53 {strides = array<i32>} : memref<144x256xbf16, #tpu.memory_space<vmem>>, vector<16x256xbf16>,
    %c244_i32 = arith.constant 244 : i32
    %55 = tpu.dynamic_rotate %40 by %c244_i32 dim 1 : vector<16x256xf32>, i32 -> vector<16x256xf32>
    %56 = arith.truncf %55 : vector<16x256xf32> to vector<16x256xbf16>
    %c80_48 = arith.constant 80 : index
    %c0_49 = arith.constant 0 : index
    %57 = vector.load %arg5[%c80_48, %c0_49] : memref<144x256xbf16, #tpu.memory_space<vmem>>, vector<16x256xbf16>
    tpu.vector_store %arg5[%c80_48, %c0_49], %56 {strides = array<i32>} : memref<144x256xbf16, #tpu.memory_space<vmem>>, vector<16x256xbf16>,
    %c236_i32 = arith.constant 236 : i32
    %58 = tpu.dynamic_rotate %40 by %c236_i32 dim 1 : vector<16x256xf32>, i32 -> vector<16x256xf32>
    %59 = arith.truncf %58 : vector<16x256xf32> to vector<16x256xbf16>
    %c96_50 = arith.constant 96 : index
    %c0_51 = arith.constant 0 : index
    %60 = vector.load %arg5[%c96_50, %c0_51] : memref<144x256xbf16, #tpu.memory_space<vmem>>, vector<16x256xbf16>
    tpu.vector_store %arg5[%c96_50, %c0_51], %59 {strides = array<i32>} : memref<144x256xbf16, #tpu.memory_space<vmem>>, vector<16x256xbf16>,
    %c235_i32 = arith.constant 235 : i32
    %61 = tpu.dynamic_rotate %40 by %c235_i32 dim 1 : vector<16x256xf32>, i32 -> vector<16x256xf32>
    %62 = arith.truncf %61 : vector<16x256xf32> to vector<16x256xbf16>
    %c112_52 = arith.constant 112 : index
    %c0_53 = arith.constant 0 : index
    %63 = vector.load %arg5[%c112_52, %c0_53] : memref<144x256xbf16, #tpu.memory_space<vmem>>, vector<16x256xbf16>
    tpu.vector_store %arg5[%c112_52, %c0_53], %62 {strides = array<i32>} : memref<144x256xbf16, #tpu.memory_space<vmem>>, vector<16x256xbf16>,
    %c234_i32 = arith.constant 234 : i32
    %64 = tpu.dynamic_rotate %40 by %c234_i32 dim 1 : vector<16x256xf32>, i32 -> vector<16x256xf32>
    %65 = arith.truncf %64 : vector<16x256xf32> to vector<16x256xbf16>
    %c128_54 = arith.constant 128 : index
    %c0_55 = arith.constant 0 : index
    %66 = vector.load %arg5[%c128_54, %c0_55] : memref<144x256xbf16, #tpu.memory_space<vmem>>, vector<16x256xbf16>
    tpu.vector_store %arg5[%c128_54, %c0_55], %65 {strides = array<i32>} : memref<144x256xbf16, #tpu.memory_space<vmem>>, vector<16x256xbf16>,
    %c1_56 = arith.constant 1 : index
    %c0_57 = arith.constant 0 : index
    %c0_58 = arith.constant 0 : index
    %67 = vector.load %arg2[%c1_56, %c0_57, %c0_58] : memref<4x16x144xbf16, #tpu.memory_space<vmem>>, vector<1x16x144xbf16>
    %68 = vector.shape_cast %67 : vector<1x16x144xbf16> to vector<16x144xbf16>
    %c0_59 = arith.constant 0 : index
    %c0_60 = arith.constant 0 : index
    %69 = vector.load %arg5[%c0_59, %c0_60] : memref<144x256xbf16, #tpu.memory_space<vmem>>, vector<144x256xbf16>
    %cst_61 = arith.constant dense<0.000000e+00> : vector<16x256xf32>
    %70 = tpu.matmul %68, %69, %cst_61 {dimension_numbers = #tpu.dot_dimension_numbers<[1], [0], [0], [1], [0, 0, 1, 1], [], []>} : vector<16x144xbf16>, vector<144x256xbf16>, vector<16x256xf32> -> vector<16x256xf32>
    %c1_62 = arith.constant 1 : index
    %c0_63 = arith.constant 0 : index
    %c0_64 = arith.constant 0 : index
    %71 = vector.load %arg3[%c1_62, %c0_63, %c0_64] : memref<4x16x1xf32, #tpu.memory_space<vmem>>, vector<1x16x1xf32>
    %72 = vector.shape_cast %71 : vector<1x16x1xf32> to vector<16x1xf32>
    %73 = vector.broadcast %72 : vector<16x1xf32> to vector<16x256xf32>
    %74 = arith.addf %70, %73 : vector<16x256xf32>
    %cst_65 = arith.constant 0.000000e+00 : f32
    %75 = vector.broadcast %cst_65 : f32 to vector<16x256xf32>
    %76 = arith.maximumf %74, %75 : vector<16x256xf32>
    %77 = arith.truncf %76 : vector<16x256xf32> to vector<16x256xbf16>
    %c0_66 = arith.constant 0 : index
    %c0_67 = arith.constant 0 : index
    %78 = vector.load %arg5[%c0_66, %c0_67] : memref<144x256xbf16, #tpu.memory_space<vmem>>, vector<16x256xbf16>
    tpu.vector_store %arg5[%c0_66, %c0_67], %77 {strides = array<i32>} : memref<144x256xbf16, #tpu.memory_space<vmem>>, vector<16x256xbf16>,
    %c255_i32_68 = arith.constant 255 : i32
    %79 = tpu.dynamic_rotate %76 by %c255_i32_68 dim 1 : vector<16x256xf32>, i32 -> vector<16x256xf32>
    %80 = arith.truncf %79 : vector<16x256xf32> to vector<16x256xbf16>
    %c16_69 = arith.constant 16 : index
    %c0_70 = arith.constant 0 : index
    %81 = vector.load %arg5[%c16_69, %c0_70] : memref<144x256xbf16, #tpu.memory_space<vmem>>, vector<16x256xbf16>
    tpu.vector_store %arg5[%c16_69, %c0_70], %80 {strides = array<i32>} : memref<144x256xbf16, #tpu.memory_space<vmem>>, vector<16x256xbf16>,
    %c254_i32_71 = arith.constant 254 : i32
    %82 = tpu.dynamic_rotate %76 by %c254_i32_71 dim 1 : vector<16x256xf32>, i32 -> vector<16x256xf32>
    %83 = arith.truncf %82 : vector<16x256xf32> to vector<16x256xbf16>
    %c32_72 = arith.constant 32 : index
    %c0_73 = arith.constant 0 : index
    %84 = vector.load %arg5[%c32_72, %c0_73] : memref<144x256xbf16, #tpu.memory_space<vmem>>, vector<16x256xbf16>
    tpu.vector_store %arg5[%c32_72, %c0_73], %83 {strides = array<i32>} : memref<144x256xbf16, #tpu.memory_space<vmem>>, vector<16x256xbf16>,
    %c246_i32_74 = arith.constant 246 : i32
    %85 = tpu.dynamic_rotate %76 by %c246_i32_74 dim 1 : vector<16x256xf32>, i32 -> vector<16x256xf32>
    %86 = arith.truncf %85 : vector<16x256xf32> to vector<16x256xbf16>
    %c48_75 = arith.constant 48 : index
    %c0_76 = arith.constant 0 : index
    %87 = vector.load %arg5[%c48_75, %c0_76] : memref<144x256xbf16, #tpu.memory_space<vmem>>, vector<16x256xbf16>
    tpu.vector_store %arg5[%c48_75, %c0_76], %86 {strides = array<i32>} : memref<144x256xbf16, #tpu.memory_space<vmem>>, vector<16x256xbf16>,
    %c245_i32_77 = arith.constant 245 : i32
    %88 = tpu.dynamic_rotate %76 by %c245_i32_77 dim 1 : vector<16x256xf32>, i32 -> vector<16x256xf32>
    %89 = arith.truncf %88 : vector<16x256xf32> to vector<16x256xbf16>
    %c64_78 = arith.constant 64 : index
    %c0_79 = arith.constant 0 : index
    %90 = vector.load %arg5[%c64_78, %c0_79] : memref<144x256xbf16, #tpu.memory_space<vmem>>, vector<16x256xbf16>
    tpu.vector_store %arg5[%c64_78, %c0_79], %89 {strides = array<i32>} : memref<144x256xbf16, #tpu.memory_space<vmem>>, vector<16x256xbf16>,
    %c244_i32_80 = arith.constant 244 : i32
    %91 = tpu.dynamic_rotate %76 by %c244_i32_80 dim 1 : vector<16x256xf32>, i32 -> vector<16x256xf32>
    %92 = arith.truncf %91 : vector<16x256xf32> to vector<16x256xbf16>
    %c80_81 = arith.constant 80 : index
    %c0_82 = arith.constant 0 : index
    %93 = vector.load %arg5[%c80_81, %c0_82] : memref<144x256xbf16, #tpu.memory_space<vmem>>, vector<16x256xbf16>
    tpu.vector_store %arg5[%c80_81, %c0_82], %92 {strides = array<i32>} : memref<144x256xbf16, #tpu.memory_space<vmem>>, vector<16x256xbf16>,
    %c236_i32_83 = arith.constant 236 : i32
    %94 = tpu.dynamic_rotate %76 by %c236_i32_83 dim 1 : vector<16x256xf32>, i32 -> vector<16x256xf32>
    %95 = arith.truncf %94 : vector<16x256xf32> to vector<16x256xbf16>
    %c96_84 = arith.constant 96 : index
    %c0_85 = arith.constant 0 : index
    %96 = vector.load %arg5[%c96_84, %c0_85] : memref<144x256xbf16, #tpu.memory_space<vmem>>, vector<16x256xbf16>
    tpu.vector_store %arg5[%c96_84, %c0_85], %95 {strides = array<i32>} : memref<144x256xbf16, #tpu.memory_space<vmem>>, vector<16x256xbf16>,
    %c235_i32_86 = arith.constant 235 : i32
    %97 = tpu.dynamic_rotate %76 by %c235_i32_86 dim 1 : vector<16x256xf32>, i32 -> vector<16x256xf32>
    %98 = arith.truncf %97 : vector<16x256xf32> to vector<16x256xbf16>
    %c112_87 = arith.constant 112 : index
    %c0_88 = arith.constant 0 : index
    %99 = vector.load %arg5[%c112_87, %c0_88] : memref<144x256xbf16, #tpu.memory_space<vmem>>, vector<16x256xbf16>
    tpu.vector_store %arg5[%c112_87, %c0_88], %98 {strides = array<i32>} : memref<144x256xbf16, #tpu.memory_space<vmem>>, vector<16x256xbf16>,
    %c234_i32_89 = arith.constant 234 : i32
    %100 = tpu.dynamic_rotate %76 by %c234_i32_89 dim 1 : vector<16x256xf32>, i32 -> vector<16x256xf32>
    %101 = arith.truncf %100 : vector<16x256xf32> to vector<16x256xbf16>
    %c128_90 = arith.constant 128 : index
    %c0_91 = arith.constant 0 : index
    %102 = vector.load %arg5[%c128_90, %c0_91] : memref<144x256xbf16, #tpu.memory_space<vmem>>, vector<16x256xbf16>
    tpu.vector_store %arg5[%c128_90, %c0_91], %101 {strides = array<i32>} : memref<144x256xbf16, #tpu.memory_space<vmem>>, vector<16x256xbf16>,
    %c2 = arith.constant 2 : index
    %c0_92 = arith.constant 0 : index
    %c0_93 = arith.constant 0 : index
    %103 = vector.load %arg2[%c2, %c0_92, %c0_93] : memref<4x16x144xbf16, #tpu.memory_space<vmem>>, vector<1x16x144xbf16>
    %104 = vector.shape_cast %103 : vector<1x16x144xbf16> to vector<16x144xbf16>
    %c0_94 = arith.constant 0 : index
    %c0_95 = arith.constant 0 : index
    %105 = vector.load %arg5[%c0_94, %c0_95] : memref<144x256xbf16, #tpu.memory_space<vmem>>, vector<144x256xbf16>
    %cst_96 = arith.constant dense<0.000000e+00> : vector<16x256xf32>
    %106 = tpu.matmul %104, %105, %cst_96 {dimension_numbers = #tpu.dot_dimension_numbers<[1], [0], [0], [1], [0, 0, 1, 1], [], []>} : vector<16x144xbf16>, vector<144x256xbf16>, vector<16x256xf32> -> vector<16x256xf32>
    %c2_97 = arith.constant 2 : index
    %c0_98 = arith.constant 0 : index
    %c0_99 = arith.constant 0 : index
    %107 = vector.load %arg3[%c2_97, %c0_98, %c0_99] : memref<4x16x1xf32, #tpu.memory_space<vmem>>, vector<1x16x1xf32>
    %108 = vector.shape_cast %107 : vector<1x16x1xf32> to vector<16x1xf32>
    %109 = vector.broadcast %108 : vector<16x1xf32> to vector<16x256xf32>
    %110 = arith.addf %106, %109 : vector<16x256xf32>
    %cst_100 = arith.constant 0.000000e+00 : f32
    %111 = vector.broadcast %cst_100 : f32 to vector<16x256xf32>
    %112 = arith.maximumf %110, %111 : vector<16x256xf32>
    %113 = arith.truncf %112 : vector<16x256xf32> to vector<16x256xbf16>
    %c0_101 = arith.constant 0 : index
    %c0_102 = arith.constant 0 : index
    %114 = vector.load %arg5[%c0_101, %c0_102] : memref<144x256xbf16, #tpu.memory_space<vmem>>, vector<16x256xbf16>
    tpu.vector_store %arg5[%c0_101, %c0_102], %113 {strides = array<i32>} : memref<144x256xbf16, #tpu.memory_space<vmem>>, vector<16x256xbf16>,
    %c255_i32_103 = arith.constant 255 : i32
    %115 = tpu.dynamic_rotate %112 by %c255_i32_103 dim 1 : vector<16x256xf32>, i32 -> vector<16x256xf32>
    %116 = arith.truncf %115 : vector<16x256xf32> to vector<16x256xbf16>
    %c16_104 = arith.constant 16 : index
    %c0_105 = arith.constant 0 : index
    %117 = vector.load %arg5[%c16_104, %c0_105] : memref<144x256xbf16, #tpu.memory_space<vmem>>, vector<16x256xbf16>
    tpu.vector_store %arg5[%c16_104, %c0_105], %116 {strides = array<i32>} : memref<144x256xbf16, #tpu.memory_space<vmem>>, vector<16x256xbf16>,
    %c254_i32_106 = arith.constant 254 : i32
    %118 = tpu.dynamic_rotate %112 by %c254_i32_106 dim 1 : vector<16x256xf32>, i32 -> vector<16x256xf32>
    %119 = arith.truncf %118 : vector<16x256xf32> to vector<16x256xbf16>
    %c32_107 = arith.constant 32 : index
    %c0_108 = arith.constant 0 : index
    %120 = vector.load %arg5[%c32_107, %c0_108] : memref<144x256xbf16, #tpu.memory_space<vmem>>, vector<16x256xbf16>
    tpu.vector_store %arg5[%c32_107, %c0_108], %119 {strides = array<i32>} : memref<144x256xbf16, #tpu.memory_space<vmem>>, vector<16x256xbf16>,
    %c246_i32_109 = arith.constant 246 : i32
    %121 = tpu.dynamic_rotate %112 by %c246_i32_109 dim 1 : vector<16x256xf32>, i32 -> vector<16x256xf32>
    %122 = arith.truncf %121 : vector<16x256xf32> to vector<16x256xbf16>
    %c48_110 = arith.constant 48 : index
    %c0_111 = arith.constant 0 : index
    %123 = vector.load %arg5[%c48_110, %c0_111] : memref<144x256xbf16, #tpu.memory_space<vmem>>, vector<16x256xbf16>
    tpu.vector_store %arg5[%c48_110, %c0_111], %122 {strides = array<i32>} : memref<144x256xbf16, #tpu.memory_space<vmem>>, vector<16x256xbf16>,
    %c245_i32_112 = arith.constant 245 : i32
    %124 = tpu.dynamic_rotate %112 by %c245_i32_112 dim 1 : vector<16x256xf32>, i32 -> vector<16x256xf32>
    %125 = arith.truncf %124 : vector<16x256xf32> to vector<16x256xbf16>
    %c64_113 = arith.constant 64 : index
    %c0_114 = arith.constant 0 : index
    %126 = vector.load %arg5[%c64_113, %c0_114] : memref<144x256xbf16, #tpu.memory_space<vmem>>, vector<16x256xbf16>
    tpu.vector_store %arg5[%c64_113, %c0_114], %125 {strides = array<i32>} : memref<144x256xbf16, #tpu.memory_space<vmem>>, vector<16x256xbf16>,
    %c244_i32_115 = arith.constant 244 : i32
    %127 = tpu.dynamic_rotate %112 by %c244_i32_115 dim 1 : vector<16x256xf32>, i32 -> vector<16x256xf32>
    %128 = arith.truncf %127 : vector<16x256xf32> to vector<16x256xbf16>
    %c80_116 = arith.constant 80 : index
    %c0_117 = arith.constant 0 : index
    %129 = vector.load %arg5[%c80_116, %c0_117] : memref<144x256xbf16, #tpu.memory_space<vmem>>, vector<16x256xbf16>
    tpu.vector_store %arg5[%c80_116, %c0_117], %128 {strides = array<i32>} : memref<144x256xbf16, #tpu.memory_space<vmem>>, vector<16x256xbf16>,
    %c236_i32_118 = arith.constant 236 : i32
    %130 = tpu.dynamic_rotate %112 by %c236_i32_118 dim 1 : vector<16x256xf32>, i32 -> vector<16x256xf32>
    %131 = arith.truncf %130 : vector<16x256xf32> to vector<16x256xbf16>
    %c96_119 = arith.constant 96 : index
    %c0_120 = arith.constant 0 : index
    %132 = vector.load %arg5[%c96_119, %c0_120] : memref<144x256xbf16, #tpu.memory_space<vmem>>, vector<16x256xbf16>
    tpu.vector_store %arg5[%c96_119, %c0_120], %131 {strides = array<i32>} : memref<144x256xbf16, #tpu.memory_space<vmem>>, vector<16x256xbf16>,
    %c235_i32_121 = arith.constant 235 : i32
    %133 = tpu.dynamic_rotate %112 by %c235_i32_121 dim 1 : vector<16x256xf32>, i32 -> vector<16x256xf32>
    %134 = arith.truncf %133 : vector<16x256xf32> to vector<16x256xbf16>
    %c112_122 = arith.constant 112 : index
    %c0_123 = arith.constant 0 : index
    %135 = vector.load %arg5[%c112_122, %c0_123] : memref<144x256xbf16, #tpu.memory_space<vmem>>, vector<16x256xbf16>
    tpu.vector_store %arg5[%c112_122, %c0_123], %134 {strides = array<i32>} : memref<144x256xbf16, #tpu.memory_space<vmem>>, vector<16x256xbf16>,
    %c234_i32_124 = arith.constant 234 : i32
    %136 = tpu.dynamic_rotate %112 by %c234_i32_124 dim 1 : vector<16x256xf32>, i32 -> vector<16x256xf32>
    %137 = arith.truncf %136 : vector<16x256xf32> to vector<16x256xbf16>
    %c128_125 = arith.constant 128 : index
    %c0_126 = arith.constant 0 : index
    %138 = vector.load %arg5[%c128_125, %c0_126] : memref<144x256xbf16, #tpu.memory_space<vmem>>, vector<16x256xbf16>
    tpu.vector_store %arg5[%c128_125, %c0_126], %137 {strides = array<i32>} : memref<144x256xbf16, #tpu.memory_space<vmem>>, vector<16x256xbf16>,
    %c3 = arith.constant 3 : index
    %c0_127 = arith.constant 0 : index
    %c0_128 = arith.constant 0 : index
    %139 = vector.load %arg2[%c3, %c0_127, %c0_128] : memref<4x16x144xbf16, #tpu.memory_space<vmem>>, vector<1x16x144xbf16>
    %140 = vector.shape_cast %139 : vector<1x16x144xbf16> to vector<16x144xbf16>
    %c0_129 = arith.constant 0 : index
    %c0_130 = arith.constant 0 : index
    %141 = vector.load %arg5[%c0_129, %c0_130] : memref<144x256xbf16, #tpu.memory_space<vmem>>, vector<144x256xbf16>
    %cst_131 = arith.constant dense<0.000000e+00> : vector<16x256xf32>
    %142 = tpu.matmul %140, %141, %cst_131 {dimension_numbers = #tpu.dot_dimension_numbers<[1], [0], [0], [1], [0, 0, 1, 1], [], []>} : vector<16x144xbf16>, vector<144x256xbf16>, vector<16x256xf32> -> vector<16x256xf32>
    %c3_132 = arith.constant 3 : index
    %c0_133 = arith.constant 0 : index
    %c0_134 = arith.constant 0 : index
    %143 = vector.load %arg3[%c3_132, %c0_133, %c0_134] : memref<4x16x1xf32, #tpu.memory_space<vmem>>, vector<1x16x1xf32>
    %144 = vector.shape_cast %143 : vector<1x16x1xf32> to vector<16x1xf32>
    %145 = vector.broadcast %144 : vector<16x1xf32> to vector<16x256xf32>
    %146 = arith.addf %142, %145 : vector<16x256xf32>
    %cst_135 = arith.constant 0.000000e+00 : f32
    %147 = vector.broadcast %cst_135 : f32 to vector<16x256xf32>
    %148 = arith.maximumf %146, %147 : vector<16x256xf32>
    %c0_136 = arith.constant 0 : index
    %c0_137 = arith.constant 0 : index
    %149 = vector.load %arg4[%c0_136, %c0_137] : memref<16x256xf32, #tpu.memory_space<vmem>>, vector<16x256xf32>
    tpu.vector_store %arg4[%c0_136, %c0_137], %148 {strides = array<i32>} : memref<16x256xf32, #tpu.memory_space<vmem>>, vector<16x256xf32>,
    return
  }
  func.func @transform_0(%arg0: i32) -> (i32, i32, i32, i32) {
    %c0_i32 = arith.constant 0 : i32
    %c0_i32_0 = arith.constant 0 : i32
    %c0_i32_1 = arith.constant 0 : i32
    %c0_i32_2 = arith.constant 0 : i32
    %c0_i32_3 = arith.constant 0 : i32
    return %c0_i32, %c0_i32_0, %c0_i32_1, %c0_i32_2 : i32, i32, i32, i32
  }
  func.func @transform_1(%arg0: i32) -> (i32, i32, i32) {
    %c0_i32 = arith.constant 0 : i32
    %c0_i32_0 = arith.constant 0 : i32
    %c0_i32_1 = arith.constant 0 : i32
    %c0_i32_2 = arith.constant 0 : i32
    return %c0_i32, %c0_i32_0, %c0_i32_1 : i32, i32, i32
  }
  func.func @transform_2(%arg0: i32) -> (i32, i32, i32) {
    %c0_i32 = arith.constant 0 : i32
    %c0_i32_0 = arith.constant 0 : i32
    %c0_i32_1 = arith.constant 0 : i32
    %c0_i32_2 = arith.constant 0 : i32
    return %c0_i32, %c0_i32_0, %c0_i32_1 : i32, i32, i32
  }
  func.func @transform_3(%arg0: i32) -> (i32, i32) {
    %c0_i32 = arith.constant 0 : i32
    %c0_i32_0 = arith.constant 0 : i32
    %c0_i32_1 = arith.constant 0 : i32
    return %c0_i32, %c0_i32_0 : i32, i32
  }
}

</mosaic_0001>

<bundles_post_ra>
// kernel: parallel_encoder_forward.1
= control target key start
LH: loop header
LB: loop body
LE: loop exit
PB: predicated region body
PF: predicated region fallthrough
CT: control target
= control target key end

     0   :  { %s2272_s28 = smov 118   ;;  %s2273_s10 = smov 127   ;;  %vm356_vm0 = vcmask 130048   ;;  %v2275_v25 = vmov 0   ;;  %v70_v28 = vlaneseq  ;;  %s2797_s0 = inlined_call_operand.vmem [shape: f32[2,2,16,256], index: 0, kind: input, shape index: {}]   ;;  %s2798_s1 = inlined_call_operand.vmem [shape: bf16[4,16,144], index: 1, kind: input, shape index: {}]   ;;  %s2799_s2 = inlined_call_operand.vmem [shape: f32[4,16,1], index: 2, kind: input, shape index: {}]   ;;  %s2800_s3 = inlined_call_operand.vmem [shape: f32[16,256], index: 3, kind: output, shape index: {}]  }
   0x1   :  { %v2304_v0 = vld [vmem:[%s2797_s0 + $0x20] sm:$0xff]  ;;  %v2309_v1 = vld [vmem:[%s2797_s0 + $0x30] sm:$0xff]  ;;  %v2328_v6 = vld [vmem:[%s2797_s0 + $0x28] sm:$0xff]  ;;  %s2274_s11 = smov 117   ;;  %2018 = vset.pattern.permute.xlu0 %v2275_v25  ;;  %2019 = vset.pattern.permute.xlu1 %v2275_v25  ;;  %s2276_s27 = smov 107  }
   0x2   :  { %v2314_v2 = vld [vmem:[%s2797_s0] sm:$0xff]  ;;  %v1968_v3 = vpack.i.bf16 %v2309_v1, %v2304_v0  ;;  %v1889_v4 = vpack.c.bf16 %v2309_v1, %v2304_v0  ;;  %v2323_v5 = vld [vmem:[%s2797_s0 + $0x10] sm:$0xff]  ;;  %v2333_v7 = vld [vmem:[%s2797_s0 + $0x38] sm:$0xff]  ;;  %v2405_v30 = vand.u32 127, %v70_v28  ;;  %s2277_s29 = smov 108   ;;  %s2278_s30 = smov 116  }
   0x3   :  { %v1978_v8 = vpack.i.bf16 %v2323_v5, %v2314_v2  ;;  %v2340_v9 = vld [vmem:[%s2797_s0 + $0x8] sm:$0xff]  ;;  %v2345_v10 = vld [vmem:[%s2797_s0 + $0x18] sm:$0xff]  ;;  %v1973_v11 = vpack.i.bf16 %v2333_v7, %v2328_v6  ;;  %v2356_v13 = vld [vmem:[%s2797_s0 + $0x40] sm:$0xff]  ;;  %v1890_v21 = vpack.c.bf16 %v2333_v7, %v2328_v6  ;;  %v1887_v23 = vpack.c.bf16 %v2323_v5, %v2314_v2  ;;  %s2279_s4 = smov 126   ;;  %s2280_s7 = smov 106  }
   0x4   :  { %1969 = vrot.lane.b32.xlu0 %v1968_v3, %s2272_s28  ;;  %v1983_v12 = vpack.i.bf16 %v2345_v10, %v2340_v9  ;;  %v2361_v14 = vld [vmem:[%s2797_s0 + $0x50] sm:$0xff]  ;;  %v2366_v15 = vld [vmem:[%s2797_s0 + $0x48] sm:$0xff]  ;;  %v2371_v16 = vld [vmem:[%s2797_s0 + $0x58] sm:$0xff]  ;;  %v1888_v22 = vpack.c.bf16 %v2345_v10, %v2340_v9  ;;  %vm153_vm1 = vcmp.lt.s32.totalorder %v2405_v30, 118  ;;  %vm72_vm2 = vcmp.lt.s32.totalorder %v2405_v30, 127 }
   0x5   :  { %1979 = vrot.lane.b32.xlu1 %v1978_v8, %s2272_s28  ;;  %v1988_v17 = vpack.i.bf16 %v2361_v14, %v2356_v13  ;;  %v1993_v18 = vpack.i.bf16 %v2371_v16, %v2366_v15  ;;  %v1894_v19 = vpack.c.bf16 %v2371_v16, %v2366_v15  ;;  %v1893_v20 = vpack.c.bf16 %v2361_v14, %v2356_v13  ;;  %v2262_v24 = vld [vmem:[%s2798_s1 + $0x4] ss:$8 sps:$4 sm:$0xff]   ;;  %v2260_v0 = vld [vmem:[%s2798_s1] ss:$8 sps:$4 sm:$0xff]  }
   0x6   :  { %1685 = vmatprep.mubr.msk.bf16.mxu0 %vm356_vm0, %v2262_v24  ;;  %v245_v26 = vld [vmem:[%s2799_s2] sm:$0xff]  ;;  %v246_v27 = vld [vmem:[%s2799_s2 + $0x8] sm:$0xff]  ;;  %vm206_vm3 = vcmp.lt.s32.totalorder %v2405_v30, 117  ;;  %vm588_vm4 = vcmp.lt.s32.totalorder %v2405_v30, 107  ;;  %vm561_vm5 = vcmp.lt.s32.totalorder %v2405_v30, 108  ;;  %vm534_vm6 = vcmp.lt.s32.totalorder %v2405_v30, 116 }
   0x7   :  { %v1643_v25 = vld [vmem:[%s2797_s0 + $0x60] sm:$0xff]  ;;  %vm455_vm7 = vcmp.lt.s32.totalorder %v2405_v30, 126  ;;  %vm615_vm8 = vcmp.lt.s32.totalorder %v2405_v30, 106 }
   0x8   :  { %1974 = vrot.lane.b32.xlu0 %v1973_v11, %s2272_s28  ;;  %v1646_v11 = vld [vmem:[%s2797_s0 + $0x78] sm:$0xff] }
   0x9   :  { %1984 = vrot.lane.b32.xlu1 %v1983_v12, %s2272_s28 }
   0xc   :  { %1989 = vrot.lane.b32.xlu0 %v1988_v17, %s2273_s10 }
   0xd   :  { %1994 = vrot.lane.b32.xlu1 %v1993_v18, %s2273_s10 }
  0x10   :  { %1999 = vrot.lane.b32.xlu0 %v1978_v8, %s2273_s10 }
  0x11   :  { %2004 = vrot.lane.b32.xlu1 %v1983_v12, %s2273_s10 }
  0x14   :  { %2009 = vrot.lane.b32.xlu0 %v1978_v8, %s2274_s11  ;;  %v1644_v8 = vld [vmem:[%s2797_s0 + $0x68] sm:$0xff] }
  0x15   :  { %2014 = vrot.lane.b32.xlu1 %v1983_v12, %s2274_s11  ;;  %v1896_v24 = vpack.c.bf16 %v1646_v11, %v1644_v8 }
  0x18   :  { %249 = vperm.xlu0 %2018, %v245_v26   ;;  %v1645_v26 = vld [vmem:[%s2797_s0 + $0x70] sm:$0xff] }
  0x19   :  { %254 = vperm.xlu1 %2019, %v246_v27  }
  0x76   :  { %v1970_v29 = vpop.permute.xlu0 %1969 }
  0x77   :  { %v1980_v31 = vpop.permute.xlu1 %1979  ;;  %v1972_v35 = vunpack.i.h.bf16 %v1970_v29  ;;  %v1971_v36 = vunpack.i.l.bf16 %v1970_v29 }
  0x78   :  { %v1982_v32 = vunpack.i.h.bf16 %v1980_v31  ;;  %v1981_v33 = vunpack.i.l.bf16 %v1980_v31 }
  0x7a   :  { %v1975_v34 = vpop.permute.xlu0 %1974 }
  0x7b   :  { %v1977_v37 = vunpack.i.h.bf16 %v1975_v34  ;;  %v1976_v38 = vunpack.i.l.bf16 %v1975_v34  ;;  %v1985_v39 = vpop.permute.xlu1 %1984 }
  0x7c   :  { %v1987_v40 = vunpack.i.h.bf16 %v1985_v39  ;;  %v1986_v41 = vunpack.i.l.bf16 %v1985_v39 }
  0x7d   :  { %v182_v42 = vsel %vm153_vm1, %v1976_v38, %v1971_v36  ;;  %v183_v43 = vsel %vm153_vm1, %v1977_v37, %v1972_v35  ;;  %v180_v44 = vsel %vm153_vm1, %v1971_v36, %v1976_v38  ;;  %v181_v45 = vsel %vm153_vm1, %v1972_v35, %v1977_v37 }
  0x7e   :  { %v1902_v46 = vpack.c.bf16 %v183_v43, %v182_v42  ;;  %v1901_v47 = vpack.c.bf16 %v181_v45, %v180_v44  ;;  %v1990_v48 = vpop.permute.xlu0 %1989  ;;  %v156_v49 = vsel %vm153_vm1, %v1986_v41, %v1981_v33  ;;  %v157_v50 = vsel %vm153_vm1, %v1987_v40, %v1982_v32 }
  0x7f   :  { %v1992_v51 = vunpack.i.h.bf16 %v1990_v48  ;;  %v1991_v52 = vunpack.i.l.bf16 %v1990_v48  ;;  %v1995_v53 = vpop.permute.xlu1 %1994  ;;  %v1900_v54 = vpack.c.bf16 %v157_v50, %v156_v49  ;;  %v154_v57 = vsel %vm153_vm1, %v1981_v33, %v1986_v41 }
  0x80   :  { %360 = vmatprep.subr.bf16.mxu0 %v1902_v46  ;;  %v1997_v55 = vunpack.i.h.bf16 %v1995_v53  ;;  %v1996_v56 = vunpack.i.l.bf16 %v1995_v53  ;;  %v155_v58 = vsel %vm153_vm1, %v1982_v32, %v1987_v40  ;;  %v1895_v32 = vpack.c.bf16 %v1645_v26, %v1643_v25  ;;  %v1706_v53 = vld [vmem:[%s2799_s2 + $0x10] sm:$0xff] }
  0x81   :  { %361 = vmatpush1.bf16.msra.mxu0 %v1901_v47  ;;  %v1899_v63 = vpack.c.bf16 %v155_v58, %v154_v57 }
  0x82   :  { %362 = vmatprep.subr.bf16.mxu0 %v1900_v54  ;;  %v129_v59 = vsel %vm72_vm2, %v1996_v56, %v1991_v52  ;;  %v130_v60 = vsel %vm72_vm2, %v1997_v55, %v1992_v51  ;;  %v127_v61 = vsel %vm72_vm2, %v1991_v52, %v1996_v56  ;;  %v128_v62 = vsel %vm72_vm2, %v1992_v51, %v1997_v55  ;;  %v2000_v12 = vpop.permute.xlu0 %1999  ;;  %v2265_v52 = vld [vmem:[%s2798_s1 + $0x14] ss:$8 sps:$4 sm:$0xff]  }
  0x83   :  { %v1898_v3 = vpack.c.bf16 %v130_v60, %v129_v59  ;;  %v2005_v17 = vpop.permute.xlu1 %2004  ;;  %v1897_v18 = vpack.c.bf16 %v128_v62, %v127_v61  ;;  %v2002_v27 = vunpack.i.h.bf16 %v2000_v12  ;;  %v2001_v28 = vunpack.i.l.bf16 %v2000_v12  ;;  %1728 = vmatprep.mubr.msk.bf16.mxu1 %vm356_vm0, %v2265_v52  ;;  %v1707_v54 = vld [vmem:[%s2799_s2 + $0x18] sm:$0xff] }
  0x84   :  { %v2007_v29 = vunpack.i.h.bf16 %v2005_v17  ;;  %v2006_v31 = vunpack.i.l.bf16 %v2005_v17 }
  0x85   :  { %363 = vmatpush1.bf16.msra.mxu0 %v1899_v63 }
  0x86   :  { %364 = vmatprep.subr.bf16.mxu0 %v1898_v3  ;;  %v75_v33 = vsel %vm72_vm2, %v2006_v31, %v2001_v28  ;;  %v76_v34 = vsel %vm72_vm2, %v2007_v29, %v2002_v27  ;;  %v73_v36 = vsel %vm72_vm2, %v2001_v28, %v2006_v31  ;;  %v74_v37 = vsel %vm72_vm2, %v2002_v27, %v2007_v29  ;;  %v2010_v38 = vpop.permute.xlu0 %2009 }
  0x87   :  { %v1892_v35 = vpack.c.bf16 %v76_v34, %v75_v33  ;;  %v2015_v39 = vpop.permute.xlu1 %2014  ;;  %v1891_v40 = vpack.c.bf16 %v74_v37, %v73_v36  ;;  %v2012_v41 = vunpack.i.h.bf16 %v2010_v38  ;;  %v2011_v42 = vunpack.i.l.bf16 %v2010_v38 }
  0x88   :  { %v2017_v43 = vunpack.i.h.bf16 %v2015_v39  ;;  %v2016_v15 = vunpack.i.l.bf16 %v2015_v39 }
  0x89   :  { %365 = vmatpush1.bf16.msra.mxu0 %v1897_v18 }
  0x8a   :  { %366 = vmatprep.subr.bf16.mxu0 %v1896_v24  ;;  %v209_v16 = vsel %vm206_vm3, %v2016_v15, %v2011_v42  ;;  %v210_v13 = vsel %vm206_vm3, %v2017_v43, %v2012_v41  ;;  %v208_v6 = vsel %vm206_vm3, %v2012_v41, %v2017_v43 }
  0x8b   :  { %v1904_v14 = vpack.c.bf16 %v210_v13, %v209_v16 }
  0x8d   :  { %367 = vmatpush1.bf16.msra.mxu0 %v1895_v32 }
  0x8e   :  { %368 = vmatprep.subr.bf16.mxu0 %v1894_v19  ;;  %v207_v19 = vsel %vm206_vm3, %v2011_v42, %v2016_v15 }
  0x8f   :  { %v1903_v7 = vpack.c.bf16 %v208_v6, %v207_v19 }
  0x91   :  { %369 = vmatpush1.bf16.msra.mxu0 %v1893_v20 }
  0x92   :  { %370 = vmatprep.subr.bf16.mxu0 %v1892_v35 }
  0x93   :  { %v250_v1 = vpop.permute.xlu0 %249 }
  0x94   :  { %v255_v10 = vpop.permute.xlu1 %254 }
  0x95   :  { %371 = vmatpush1.bf16.msra.mxu0 %v1891_v40 }
  0x96   :  { %372 = vmatprep.subr.bf16.mxu0 %v1890_v21 }
  0x99   :  { %373 = vmatpush1.bf16.msra.mxu0 %v1889_v4 }
  0x9a   :  { %374 = vmatprep.subr.bf16.mxu0 %v1888_v22 }
  0x9d   :  { %375 = vmatpush1.bf16.msra.mxu0 %v1887_v23 }
  0x9e   :  { %390 = vmatprep.subr.bf16.mxu0 %v1904_v14 }
  0xa1   :  { %391 = vmatpush2.bf16.msra.mxu0 %v1903_v7 }
  0xa4   :  { %393 = vmatmul.mubr.bf16.vlgmr.msra.gmra.mxu0 %v2260_v0 }
 0x164   :  { %v394_v4 = vpop.f32.mrf.mxu0 }
 0x165   :  { %v395_v20 = vadd.f32 %v394_v4, %v250_v1 }
 0x166   :  { %v396_v9 = vpop.f32.mrf.mxu0 }
 0x167   :  { %v397_v22 = vadd.f32 %v396_v9, %v250_v1  ;;  %v403_v46 = vmax.f32 %v395_v20, 0.0 }
 0x168   :  { %v398_v21 = vpop.f32.mrf.mxu0 }
 0x169   :  { %v399_v44 = vadd.f32 %v398_v21, %v255_v10  ;;  %v404_v23 = vmax.f32 %v397_v22, 0.0 }
 0x16a   :  { %v400_v45 = vpop.f32.mrf.mxu0 }
 0x16b   :  { %v405_v2 = vmax.f32 %v399_v44, 0.0  ;;  %v401_v5 = vadd.f32 %v400_v45, %v255_v10 }
 0x16d   :  { %v406_v47 = vmax.f32 %v401_v5, 0.0  ;;  %v2020_v48 = vpack.i.bf16 %v405_v2, %v403_v46  ;;  %v2487_v51 = vpack.c.bf16 %v405_v2, %v403_v46 }
 0x16f   :  { %2021 = vrot.lane.b32.xlu1 %v2020_v48, %s2276_s27  ;;  %v2055_v49 = vpack.i.bf16 %v406_v47, %v404_v23  ;;  %v2485_v50 = vpack.c.bf16 %v406_v47, %v404_v23 }
 0x171   :  { %2056 = vrot.lane.b32.xlu0 %v2055_v49, %s2276_s27 }
 0x173   :  { %2026 = vrot.lane.b32.xlu1 %v2020_v48, %s2277_s29 }
 0x175   :  { %2061 = vrot.lane.b32.xlu0 %v2055_v49, %s2277_s29 }
 0x177   :  { %2031 = vrot.lane.b32.xlu1 %v2020_v48, %s2278_s30 }
 0x179   :  { %2066 = vrot.lane.b32.xlu0 %v2055_v49, %s2278_s30 }
 0x17b   :  { %2036 = vrot.lane.b32.xlu1 %v2020_v48, %s2274_s11 }
 0x17d   :  { %2071 = vrot.lane.b32.xlu0 %v2055_v49, %s2274_s11 }
 0x17f   :  { %2041 = vrot.lane.b32.xlu1 %v2020_v48, %s2272_s28 }
 0x181   :  { %2076 = vrot.lane.b32.xlu0 %v2055_v49, %s2272_s28 }
 0x183   :  { %2046 = vrot.lane.b32.xlu1 %v2020_v48, %s2279_s4 }
 0x185   :  { %2081 = vrot.lane.b32.xlu0 %v2055_v49, %s2279_s4 }
 0x187   :  { %2051 = vrot.lane.b32.xlu1 %v2020_v48, %s2273_s10 }
 0x189   :  { %2086 = vrot.lane.b32.xlu0 %v2055_v49, %s2273_s10 }
 0x18b   :  { %2091 = vrot.lane.b32.xlu1 %v2020_v48, %s2280_s7 }
 0x18d   :  { %2096 = vrot.lane.b32.xlu0 %v2055_v49, %s2280_s7 }
 0x18f   :  { %660 = vperm.xlu1 %2019, %v1706_v53  }
 0x191   :  { %665 = vperm.xlu0 %2018, %v1707_v54  }
 0x1e1   :  { %v2022_v55 = vpop.permute.xlu1 %2021 }
 0x1e2   :  { %v2024_v57 = vunpack.i.h.bf16 %v2022_v55  ;;  %v2023_v58 = vunpack.i.l.bf16 %v2022_v55 }
 0x1e3   :  { %v2057_v56 = vpop.permute.xlu0 %2056 }
 0x1e4   :  { %v2059_v59 = vunpack.i.h.bf16 %v2057_v56  ;;  %v2058_v60 = vunpack.i.l.bf16 %v2057_v56 }
 0x1e5   :  { %v2027_v61 = vpop.permute.xlu1 %2026 }
 0x1e6   :  { %v591_v62 = vsel %vm588_vm4, %v2058_v60, %v2023_v58  ;;  %v592_v63 = vsel %vm588_vm4, %v2059_v59, %v2024_v57  ;;  %v2029_v3 = vunpack.i.h.bf16 %v2027_v61  ;;  %v589_v12 = vsel %vm588_vm4, %v2023_v58, %v2058_v60 }
 0x1e7   :  { %v2062_v8 = vpop.permute.xlu0 %2061  ;;  %v1920_v11 = vpack.c.bf16 %v592_v63, %v591_v62  ;;  %v590_v17 = vsel %vm588_vm4, %v2024_v57, %v2059_v59  ;;  %v2028_v18 = vunpack.i.l.bf16 %v2027_v61 }
 0x1e8   :  { %v2064_v24 = vunpack.i.h.bf16 %v2062_v8  ;;  %v2063_v25 = vunpack.i.l.bf16 %v2062_v8  ;;  %v1919_v26 = vpack.c.bf16 %v590_v17, %v589_v12 }
 0x1e9   :  { %v2032_v27 = vpop.permute.xlu1 %2031  ;;  %770 = vmatprep.subr.bf16.mxu1 %v1920_v11 }
 0x1ea   :  { %771 = vmatpush1.bf16.msra.mxu1 %v1919_v26  ;;  %v564_v28 = vsel %vm561_vm5, %v2063_v25, %v2028_v18  ;;  %v565_v29 = vsel %vm561_vm5, %v2064_v24, %v2029_v3  ;;  %v2034_v31 = vunpack.i.h.bf16 %v2032_v27  ;;  %v562_v34 = vsel %vm561_vm5, %v2028_v18, %v2063_v25 }
 0x1eb   :  { %v2067_v32 = vpop.permute.xlu0 %2066  ;;  %v1918_v33 = vpack.c.bf16 %v565_v29, %v564_v28  ;;  %v563_v35 = vsel %vm561_vm5, %v2029_v3, %v2064_v24  ;;  %v2033_v36 = vunpack.i.l.bf16 %v2032_v27 }
 0x1ec   :  { %v2069_v37 = vunpack.i.h.bf16 %v2067_v32  ;;  %v2068_v38 = vunpack.i.l.bf16 %v2067_v32  ;;  %v1917_v39 = vpack.c.bf16 %v563_v35, %v562_v34 }
 0x1ed   :  { %v2037_v40 = vpop.permute.xlu1 %2036  ;;  %772 = vmatprep.subr.bf16.mxu1 %v1918_v33 }
 0x1ee   :  { %773 = vmatpush1.bf16.msra.mxu1 %v1917_v39  ;;  %v537_v41 = vsel %vm534_vm6, %v2068_v38, %v2033_v36  ;;  %v538_v42 = vsel %vm534_vm6, %v2069_v37, %v2034_v31  ;;  %v2039_v43 = vunpack.i.h.bf16 %v2037_v40  ;;  %v535_v13 = vsel %vm534_vm6, %v2033_v36, %v2068_v38 }
 0x1ef   :  { %v2072_v15 = vpop.permute.xlu0 %2071  ;;  %v1916_v16 = vpack.c.bf16 %v538_v42, %v537_v41  ;;  %v536_v14 = vsel %vm534_vm6, %v2034_v31, %v2069_v37  ;;  %v2038_v19 = vunpack.i.l.bf16 %v2037_v40 }
 0x1f0   :  { %v2074_v6 = vunpack.i.h.bf16 %v2072_v15  ;;  %v2073_v7 = vunpack.i.l.bf16 %v2072_v15  ;;  %v1915_v0 = vpack.c.bf16 %v536_v14, %v535_v13 }
 0x1f1   :  { %v2042_v1 = vpop.permute.xlu1 %2041  ;;  %774 = vmatprep.subr.bf16.mxu1 %v1916_v16  ;;  %v2263_v16 = vld [vmem:[%s2798_s1 + $0x10] ss:$8 sps:$4 sm:$0xff]  }
 0x1f2   :  { %775 = vmatpush1.bf16.msra.mxu1 %v1915_v0  ;;  %v510_v4 = vsel %vm206_vm3, %v2073_v7, %v2038_v19  ;;  %v511_v9 = vsel %vm206_vm3, %v2074_v6, %v2039_v43  ;;  %v2044_v10 = vunpack.i.h.bf16 %v2042_v1  ;;  %v508_v22 = vsel %vm206_vm3, %v2038_v19, %v2073_v7 }
 0x1f3   :  { %v2077_v20 = vpop.permute.xlu0 %2076  ;;  %v1914_v21 = vpack.c.bf16 %v511_v9, %v510_v4  ;;  %v509_v44 = vsel %vm206_vm3, %v2039_v43, %v2074_v6  ;;  %v2043_v45 = vunpack.i.l.bf16 %v2042_v1 }
 0x1f4   :  { %v2079_v46 = vunpack.i.h.bf16 %v2077_v20  ;;  %v2078_v2 = vunpack.i.l.bf16 %v2077_v20  ;;  %v1913_v5 = vpack.c.bf16 %v509_v44, %v508_v22 }
 0x1f5   :  { %v2047_v23 = vpop.permute.xlu1 %2046  ;;  %776 = vmatprep.subr.bf16.mxu1 %v1914_v21 }
 0x1f6   :  { %777 = vmatpush1.bf16.msra.mxu1 %v1913_v5  ;;  %v484_v47 = vsel %vm153_vm1, %v2078_v2, %v2043_v45  ;;  %v485_v48 = vsel %vm153_vm1, %v2079_v46, %v2044_v10  ;;  %v2049_v49 = vunpack.i.h.bf16 %v2047_v23  ;;  %v482_v54 = vsel %vm153_vm1, %v2043_v45, %v2078_v2  ;;  %v2266_v2 = vld [vmem:[%s2798_s1 + $0x24] ss:$8 sps:$4 sm:$0xff]  }
 0x1f7   :  { %v2082_v52 = vpop.permute.xlu0 %2081  ;;  %v1912_v53 = vpack.c.bf16 %v485_v48, %v484_v47  ;;  %v483_v55 = vsel %vm153_vm1, %v2044_v10, %v2079_v46  ;;  %v2048_v56 = vunpack.i.l.bf16 %v2047_v23  ;;  %v1749_v5 = vld [vmem:[%s2799_s2 + $0x20] sm:$0xff]  ;;  %1771 = vmatprep.mubr.msk.bf16.mxu0 %vm356_vm0, %v2266_v2  ;;  %v1750_v23 = vld [vmem:[%s2799_s2 + $0x28] sm:$0xff] }
 0x1f8   :  { %v2084_v57 = vunpack.i.h.bf16 %v2082_v52  ;;  %v2083_v58 = vunpack.i.l.bf16 %v2082_v52  ;;  %v1911_v59 = vpack.c.bf16 %v483_v55, %v482_v54 }
 0x1f9   :  { %v2052_v60 = vpop.permute.xlu1 %2051  ;;  %778 = vmatprep.subr.bf16.mxu1 %v1912_v53 }
 0x1fa   :  { %779 = vmatpush1.bf16.msra.mxu1 %v1911_v59  ;;  %v458_v61 = vsel %vm455_vm7, %v2083_v58, %v2048_v56  ;;  %v459_v62 = vsel %vm455_vm7, %v2084_v57, %v2049_v49  ;;  %v2054_v63 = vunpack.i.h.bf16 %v2052_v60  ;;  %v456_v11 = vsel %vm455_vm7, %v2048_v56, %v2083_v58 }
 0x1fb   :  { %v2087_v3 = vpop.permute.xlu0 %2086  ;;  %v1910_v8 = vpack.c.bf16 %v459_v62, %v458_v61  ;;  %v457_v12 = vsel %vm455_vm7, %v2049_v49, %v2084_v57  ;;  %v2053_v17 = vunpack.i.l.bf16 %v2052_v60 }
 0x1fc   :  { %v2089_v18 = vunpack.i.h.bf16 %v2087_v3  ;;  %v2088_v24 = vunpack.i.l.bf16 %v2087_v3  ;;  %v1909_v25 = vpack.c.bf16 %v457_v12, %v456_v11 }
 0x1fd   :  { %v2092_v26 = vpop.permute.xlu1 %2091  ;;  %780 = vmatprep.subr.bf16.mxu1 %v1910_v8 }
 0x1fe   :  { %781 = vmatpush1.bf16.msra.mxu1 %v1909_v25  ;;  %v431_v27 = vsel %vm72_vm2, %v2088_v24, %v2053_v17  ;;  %v432_v28 = vsel %vm72_vm2, %v2089_v18, %v2054_v63  ;;  %v2094_v29 = vunpack.i.h.bf16 %v2092_v26  ;;  %v429_v33 = vsel %vm72_vm2, %v2053_v17, %v2088_v24 }
 0x1ff   :  { %v2097_v31 = vpop.permute.xlu0 %2096  ;;  %v1908_v32 = vpack.c.bf16 %v432_v28, %v431_v27  ;;  %v430_v34 = vsel %vm72_vm2, %v2054_v63, %v2089_v18  ;;  %v2093_v35 = vunpack.i.l.bf16 %v2092_v26 }
 0x200   :  { %v2099_v36 = vunpack.i.h.bf16 %v2097_v31  ;;  %v2098_v37 = vunpack.i.l.bf16 %v2097_v31  ;;  %v1907_v38 = vpack.c.bf16 %v430_v34, %v429_v33 }
 0x201   :  { %782 = vmatprep.subr.bf16.mxu1 %v1908_v32 }
 0x202   :  { %783 = vmatpush1.bf16.msra.mxu1 %v1907_v38  ;;  %v618_v39 = vsel %vm615_vm8, %v2098_v37, %v2093_v35  ;;  %v619_v40 = vsel %vm615_vm8, %v2099_v36, %v2094_v29  ;;  %v616_v42 = vsel %vm615_vm8, %v2093_v35, %v2098_v37  ;;  %v617_v43 = vsel %vm615_vm8, %v2094_v29, %v2099_v36 }
 0x203   :  { %784 = vmatprep.subr.bf16.mxu1 %v2485_v50  ;;  %v1922_v41 = vpack.c.bf16 %v619_v40, %v618_v39  ;;  %v1921_v15 = vpack.c.bf16 %v617_v43, %v616_v42 }
 0x206   :  { %785 = vmatpush1.bf16.msra.mxu1 %v2487_v51 }
 0x207   :  { %800 = vmatprep.subr.bf16.mxu1 %v1922_v41 }
 0x20a   :  { %801 = vmatpush2.bf16.msra.mxu1 %v1921_v15  ;;  %v661_v14 = vpop.permute.xlu1 %660 }
 0x20c   :  { %v666_v6 = vpop.permute.xlu0 %665 }
 0x20d   :  { %803 = vmatmul.mubr.bf16.vlgmr.msra.gmra.mxu1 %v2263_v16 }
 0x2cd   :  { %v804_v13 = vpop.f32.mrf.mxu1 }
 0x2ce   :  { %v805_v19 = vadd.f32 %v804_v13, %v661_v14 }
 0x2cf   :  { %v806_v50 = vpop.f32.mrf.mxu1 }
 0x2d0   :  { %v807_v0 = vadd.f32 %v806_v50, %v661_v14  ;;  %v813_v9 = vmax.f32 %v805_v19, 0.0 }
 0x2d1   :  { %v808_v7 = vpop.f32.mrf.mxu1 }
 0x2d2   :  { %v809_v1 = vadd.f32 %v808_v7, %v666_v6  ;;  %v814_v20 = vmax.f32 %v807_v0, 0.0 }
 0x2d3   :  { %v810_v4 = vpop.f32.mrf.mxu1 }
 0x2d4   :  { %v815_v10 = vmax.f32 %v809_v1, 0.0  ;;  %v811_v51 = vadd.f32 %v810_v4, %v666_v6 }
 0x2d6   :  { %v816_v21 = vmax.f32 %v811_v51, 0.0  ;;  %v2100_v22 = vpack.i.bf16 %v815_v10, %v813_v9  ;;  %v2591_v46 = vpack.c.bf16 %v815_v10, %v813_v9 }
 0x2d8   :  { %2101 = vrot.lane.b32.xlu1 %v2100_v22, %s2276_s27  ;;  %v2135_v44 = vpack.i.bf16 %v816_v21, %v814_v20  ;;  %v2589_v45 = vpack.c.bf16 %v816_v21, %v814_v20 }
 0x2da   :  { %2136 = vrot.lane.b32.xlu0 %v2135_v44, %s2276_s27 }
 0x2dc   :  { %2106 = vrot.lane.b32.xlu1 %v2100_v22, %s2277_s29 }
 0x2de   :  { %2141 = vrot.lane.b32.xlu0 %v2135_v44, %s2277_s29 }
 0x2e0   :  { %2111 = vrot.lane.b32.xlu1 %v2100_v22, %s2278_s30 }
 0x2e2   :  { %2146 = vrot.lane.b32.xlu0 %v2135_v44, %s2278_s30 }
 0x2e4   :  { %2116 = vrot.lane.b32.xlu1 %v2100_v22, %s2274_s11 }
 0x2e6   :  { %2151 = vrot.lane.b32.xlu0 %v2135_v44, %s2274_s11 }
 0x2e8   :  { %2121 = vrot.lane.b32.xlu1 %v2100_v22, %s2272_s28 }
 0x2ea   :  { %2156 = vrot.lane.b32.xlu0 %v2135_v44, %s2272_s28 }
 0x2ec   :  { %2126 = vrot.lane.b32.xlu1 %v2100_v22, %s2279_s4 }
 0x2ee   :  { %2161 = vrot.lane.b32.xlu0 %v2135_v44, %s2279_s4 }
 0x2f0   :  { %2131 = vrot.lane.b32.xlu1 %v2100_v22, %s2273_s10 }
 0x2f2   :  { %2166 = vrot.lane.b32.xlu0 %v2135_v44, %s2273_s10 }
 0x2f4   :  { %2171 = vrot.lane.b32.xlu1 %v2100_v22, %s2280_s7 }
 0x2f6   :  { %2176 = vrot.lane.b32.xlu0 %v2135_v44, %s2280_s7 }
 0x2f8   :  { %1065 = vperm.xlu1 %2019, %v1749_v5  }
 0x2fa   :  { %1070 = vperm.xlu0 %2018, %v1750_v23  }
 0x34a   :  { %v2102_v47 = vpop.permute.xlu1 %2101 }
 0x34b   :  { %v2104_v49 = vunpack.i.h.bf16 %v2102_v47  ;;  %v2103_v52 = vunpack.i.l.bf16 %v2102_v47 }
 0x34c   :  { %v2137_v48 = vpop.permute.xlu0 %2136 }
 0x34d   :  { %v2139_v53 = vunpack.i.h.bf16 %v2137_v48  ;;  %v2138_v54 = vunpack.i.l.bf16 %v2137_v48 }
 0x34e   :  { %v2107_v55 = vpop.permute.xlu1 %2106 }
 0x34f   :  { %v995_v56 = vsel %vm588_vm4, %v2103_v52, %v2138_v54  ;;  %v996_v57 = vsel %vm588_vm4, %v2104_v49, %v2139_v53  ;;  %v2109_v59 = vunpack.i.h.bf16 %v2107_v55  ;;  %v997_v61 = vsel %vm588_vm4, %v2138_v54, %v2103_v52 }
 0x350   :  { %v1937_v58 = vpack.c.bf16 %v996_v57, %v995_v56  ;;  %v2142_v60 = vpop.permute.xlu0 %2141  ;;  %v998_v62 = vsel %vm588_vm4, %v2139_v53, %v2104_v49  ;;  %v2108_v63 = vunpack.i.l.bf16 %v2107_v55 }
 0x351   :  { %v2144_v3 = vunpack.i.h.bf16 %v2142_v60  ;;  %v2143_v8 = vunpack.i.l.bf16 %v2142_v60  ;;  %v1938_v11 = vpack.c.bf16 %v998_v62, %v997_v61 }
 0x352   :  { %v2112_v12 = vpop.permute.xlu1 %2111 }
 0x353   :  { %v969_v17 = vsel %vm561_vm5, %v2108_v63, %v2143_v8  ;;  %v970_v18 = vsel %vm561_vm5, %v2109_v59, %v2144_v3  ;;  %1175 = vmatprep.subr.bf16.mxu0 %v1938_v11  ;;  %v2114_v25 = vunpack.i.h.bf16 %v2112_v12  ;;  %v971_v27 = vsel %vm561_vm5, %v2143_v8, %v2108_v63 }
 0x354   :  { %v1935_v24 = vpack.c.bf16 %v970_v18, %v969_v17  ;;  %1176 = vmatpush1.bf16.msra.mxu0 %v1937_v58  ;;  %v2147_v26 = vpop.permute.xlu0 %2146  ;;  %v972_v28 = vsel %vm561_vm5, %v2144_v3, %v2109_v59  ;;  %v2113_v29 = vunpack.i.l.bf16 %v2112_v12 }
 0x355   :  { %v2149_v31 = vunpack.i.h.bf16 %v2147_v26  ;;  %v2148_v32 = vunpack.i.l.bf16 %v2147_v26  ;;  %v1936_v33 = vpack.c.bf16 %v972_v28, %v971_v27 }
 0x356   :  { %v2117_v34 = vpop.permute.xlu1 %2116 }
 0x357   :  { %v943_v35 = vsel %vm534_vm6, %v2113_v29, %v2148_v32  ;;  %v944_v36 = vsel %vm534_vm6, %v2114_v25, %v2149_v31  ;;  %1177 = vmatprep.subr.bf16.mxu0 %v1936_v33  ;;  %v2119_v38 = vunpack.i.h.bf16 %v2117_v34  ;;  %v945_v40 = vsel %vm534_vm6, %v2148_v32, %v2113_v29 }
 0x358   :  { %v1933_v37 = vpack.c.bf16 %v944_v36, %v943_v35  ;;  %1178 = vmatpush1.bf16.msra.mxu0 %v1935_v24  ;;  %v2152_v39 = vpop.permute.xlu0 %2151  ;;  %v946_v41 = vsel %vm534_vm6, %v2149_v31, %v2114_v25  ;;  %v2118_v42 = vunpack.i.l.bf16 %v2117_v34 }
 0x359   :  { %v2154_v43 = vunpack.i.h.bf16 %v2152_v39  ;;  %v2153_v15 = vunpack.i.l.bf16 %v2152_v39  ;;  %v1934_v16 = vpack.c.bf16 %v946_v41, %v945_v40  ;;  %v2268_v39 = vld [vmem:[%s2798_s1 + $0x20] ss:$8 sps:$4 sm:$0xff]  }
 0x35a   :  { %v2122_v13 = vpop.permute.xlu1 %2121 }
 0x35b   :  { %v917_v14 = vsel %vm206_vm3, %v2118_v42, %v2153_v15  ;;  %v918_v50 = vsel %vm206_vm3, %v2119_v38, %v2154_v43  ;;  %1179 = vmatprep.subr.bf16.mxu0 %v1934_v16  ;;  %v2124_v6 = vunpack.i.h.bf16 %v2122_v13  ;;  %v919_v0 = vsel %vm206_vm3, %v2153_v15, %v2118_v42 }
 0x35c   :  { %v1931_v19 = vpack.c.bf16 %v918_v50, %v917_v14  ;;  %1180 = vmatpush1.bf16.msra.mxu0 %v1933_v37  ;;  %v2157_v7 = vpop.permute.xlu0 %2156  ;;  %v920_v1 = vsel %vm206_vm3, %v2154_v43, %v2119_v38  ;;  %v2123_v4 = vunpack.i.l.bf16 %v2122_v13 }
 0x35d   :  { %v2159_v9 = vunpack.i.h.bf16 %v2157_v7  ;;  %v2158_v10 = vunpack.i.l.bf16 %v2157_v7  ;;  %v1932_v51 = vpack.c.bf16 %v920_v1, %v919_v0 }
 0x35e   :  { %v2127_v20 = vpop.permute.xlu1 %2126 }
 0x35f   :  { %v891_v21 = vsel %vm153_vm1, %v2123_v4, %v2158_v10  ;;  %v892_v22 = vsel %vm153_vm1, %v2124_v6, %v2159_v9  ;;  %1181 = vmatprep.subr.bf16.mxu0 %v1932_v51  ;;  %v2129_v2 = vunpack.i.h.bf16 %v2127_v20  ;;  %v893_v23 = vsel %vm153_vm1, %v2158_v10, %v2123_v4  ;;  %v2269_v10 = vld [vmem:[%s2798_s1 + $0x34] ss:$8 sps:$4 sm:$0xff]  }
 0x360   :  { %v1929_v44 = vpack.c.bf16 %v892_v22, %v891_v21  ;;  %1182 = vmatpush1.bf16.msra.mxu0 %v1931_v19  ;;  %v2162_v5 = vpop.permute.xlu0 %2161  ;;  %v894_v47 = vsel %vm153_vm1, %v2159_v9, %v2124_v6  ;;  %v2128_v48 = vunpack.i.l.bf16 %v2127_v20  ;;  %v1792_v51 = vld [vmem:[%s2799_s2 + $0x30] sm:$0xff]  ;;  %1814 = vmatprep.mubr.msk.bf16.mxu1 %vm356_vm0, %v2269_v10  ;;  %v1793_v20 = vld [vmem:[%s2799_s2 + $0x38] sm:$0xff] }
 0x361   :  { %v2164_v49 = vunpack.i.h.bf16 %v2162_v5  ;;  %v2163_v52 = vunpack.i.l.bf16 %v2162_v5  ;;  %v1930_v53 = vpack.c.bf16 %v894_v47, %v893_v23 }
 0x362   :  { %v2132_v54 = vpop.permute.xlu1 %2131 }
 0x363   :  { %v865_v55 = vsel %vm455_vm7, %v2128_v48, %v2163_v52  ;;  %v866_v56 = vsel %vm455_vm7, %v2129_v2, %v2164_v49  ;;  %1183 = vmatprep.subr.bf16.mxu0 %v1930_v53  ;;  %v2134_v58 = vunpack.i.h.bf16 %v2132_v54  ;;  %v867_v60 = vsel %vm455_vm7, %v2163_v52, %v2128_v48 }
 0x364   :  { %v1927_v57 = vpack.c.bf16 %v866_v56, %v865_v55  ;;  %1184 = vmatpush1.bf16.msra.mxu0 %v1929_v44  ;;  %v2167_v59 = vpop.permute.xlu0 %2166  ;;  %v868_v61 = vsel %vm455_vm7, %v2164_v49, %v2129_v2  ;;  %v2133_v62 = vunpack.i.l.bf16 %v2132_v54 }
 0x365   :  { %v2169_v63 = vunpack.i.h.bf16 %v2167_v59  ;;  %v2168_v3 = vunpack.i.l.bf16 %v2167_v59  ;;  %v1928_v8 = vpack.c.bf16 %v868_v61, %v867_v60 }
 0x366   :  { %v2172_v17 = vpop.permute.xlu1 %2171 }
 0x367   :  { %v839_v11 = vsel %vm72_vm2, %v2133_v62, %v2168_v3  ;;  %v840_v12 = vsel %vm72_vm2, %v2134_v58, %v2169_v63  ;;  %1185 = vmatprep.subr.bf16.mxu0 %v1928_v8  ;;  %v841_v25 = vsel %vm72_vm2, %v2168_v3, %v2133_v62  ;;  %v842_v26 = vsel %vm72_vm2, %v2169_v63, %v2134_v58 }
 0x368   :  { %v1925_v18 = vpack.c.bf16 %v840_v12, %v839_v11  ;;  %1186 = vmatpush1.bf16.msra.mxu0 %v1927_v57  ;;  %v2177_v24 = vpop.permute.xlu0 %2176  ;;  %v1926_v29 = vpack.c.bf16 %v842_v26, %v841_v25  ;;  %v2174_v31 = vunpack.i.h.bf16 %v2172_v17  ;;  %v2173_v32 = vunpack.i.l.bf16 %v2172_v17 }
 0x369   :  { %v2179_v27 = vunpack.i.h.bf16 %v2177_v24  ;;  %v2178_v28 = vunpack.i.l.bf16 %v2177_v24 }
 0x36a   :  { %1187 = vmatprep.subr.bf16.mxu0 %v1926_v29 }
 0x36b   :  { %v1023_v33 = vsel %vm615_vm8, %v2178_v28, %v2173_v32  ;;  %v1024_v34 = vsel %vm615_vm8, %v2179_v27, %v2174_v31  ;;  %v1021_v35 = vsel %vm615_vm8, %v2173_v32, %v2178_v28  ;;  %v1022_v36 = vsel %vm615_vm8, %v2174_v31, %v2179_v27 }
 0x36c   :  { %1188 = vmatpush1.bf16.msra.mxu0 %v1925_v18  ;;  %v1940_v37 = vpack.c.bf16 %v1024_v34, %v1023_v33  ;;  %v1939_v38 = vpack.c.bf16 %v1022_v36, %v1021_v35 }
 0x36d   :  { %1189 = vmatprep.subr.bf16.mxu0 %v2589_v45 }
 0x370   :  { %1190 = vmatpush1.bf16.msra.mxu0 %v2591_v46 }
 0x371   :  { %1205 = vmatprep.subr.bf16.mxu0 %v1940_v37 }
 0x373   :  { %v1066_v41 = vpop.permute.xlu1 %1065 }
 0x374   :  { %1206 = vmatpush2.bf16.msra.mxu0 %v1939_v38 }
 0x375   :  { %v1071_v43 = vpop.permute.xlu0 %1070 }
 0x377   :  { %1208 = vmatmul.mubr.bf16.vlgmr.msra.gmra.mxu0 %v2268_v39 }
 0x437   :  { %v1209_v40 = vpop.f32.mrf.mxu0 }
 0x438   :  { %v1210_v42 = vadd.f32 %v1209_v40, %v1066_v41 }
 0x439   :  { %v1211_v45 = vpop.f32.mrf.mxu0 }
 0x43a   :  { %v1212_v16 = vadd.f32 %v1211_v45, %v1066_v41  ;;  %v1218_v50 = vmax.f32 %v1210_v42, 0.0 }
 0x43b   :  { %v1213_v15 = vpop.f32.mrf.mxu0 }
 0x43c   :  { %v1214_v13 = vadd.f32 %v1213_v15, %v1071_v43  ;;  %v1219_v6 = vmax.f32 %v1212_v16, 0.0 }
 0x43d   :  { %v1215_v14 = vpop.f32.mrf.mxu0 }
 0x43e   :  { %v1220_v19 = vmax.f32 %v1214_v13, 0.0  ;;  %v1216_v46 = vadd.f32 %v1215_v14, %v1071_v43 }
 0x440   :  { %v1221_v7 = vmax.f32 %v1216_v46, 0.0  ;;  %v2180_v0 = vpack.i.bf16 %v1220_v19, %v1218_v50  ;;  %v2690_v9 = vpack.c.bf16 %v1220_v19, %v1218_v50 }
 0x442   :  { %2181 = vrot.lane.b32.xlu1 %v2180_v0, %s2276_s27  ;;  %v2215_v1 = vpack.i.bf16 %v1221_v7, %v1219_v6  ;;  %v2688_v4 = vpack.c.bf16 %v1221_v7, %v1219_v6 }
 0x444   :  { %2216 = vrot.lane.b32.xlu0 %v2215_v1, %s2276_s27 }
 0x446   :  { %2186 = vrot.lane.b32.xlu1 %v2180_v0, %s2277_s29 }
 0x448   :  { %2221 = vrot.lane.b32.xlu0 %v2215_v1, %s2277_s29 }
 0x44a   :  { %2191 = vrot.lane.b32.xlu1 %v2180_v0, %s2278_s30 }
 0x44c   :  { %2226 = vrot.lane.b32.xlu0 %v2215_v1, %s2278_s30 }
 0x44e   :  { %2196 = vrot.lane.b32.xlu1 %v2180_v0, %s2274_s11 }
 0x450   :  { %2231 = vrot.lane.b32.xlu0 %v2215_v1, %s2274_s11 }
 0x452   :  { %2201 = vrot.lane.b32.xlu1 %v2180_v0, %s2272_s28 }
 0x454   :  { %2236 = vrot.lane.b32.xlu0 %v2215_v1, %s2272_s28 }
 0x456   :  { %2206 = vrot.lane.b32.xlu1 %v2180_v0, %s2279_s4 }
 0x458   :  { %2241 = vrot.lane.b32.xlu0 %v2215_v1, %s2279_s4 }
 0x45a   :  { %2211 = vrot.lane.b32.xlu1 %v2180_v0, %s2273_s10 }
 0x45c   :  { %2246 = vrot.lane.b32.xlu0 %v2215_v1, %s2273_s10 }
 0x45e   :  { %2251 = vrot.lane.b32.xlu1 %v2180_v0, %s2280_s7 }
 0x460   :  { %2256 = vrot.lane.b32.xlu0 %v2215_v1, %s2280_s7 }
 0x462   :  { %1470 = vperm.xlu1 %2019, %v1792_v51  }
 0x464   :  { %1475 = vperm.xlu0 %2018, %v1793_v20  }
 0x4b4   :  { %v2182_v21 = vpop.permute.xlu1 %2181 }
 0x4b5   :  { %v2184_v44 = vunpack.i.h.bf16 %v2182_v21  ;;  %v2183_v2 = vunpack.i.l.bf16 %v2182_v21 }
 0x4b6   :  { %v2217_v22 = vpop.permute.xlu0 %2216 }
 0x4b7   :  { %v2219_v5 = vunpack.i.h.bf16 %v2217_v22  ;;  %v2218_v23 = vunpack.i.l.bf16 %v2217_v22 }
 0x4b8   :  { %v2187_v47 = vpop.permute.xlu1 %2186 }
 0x4b9   :  { %v1400_v48 = vsel %vm588_vm4, %v2183_v2, %v2218_v23  ;;  %v1401_v49 = vsel %vm588_vm4, %v2184_v44, %v2219_v5  ;;  %v2189_v53 = vunpack.i.h.bf16 %v2187_v47  ;;  %v1402_v55 = vsel %vm588_vm4, %v2218_v23, %v2183_v2 }
 0x4ba   :  { %v1955_v52 = vpack.c.bf16 %v1401_v49, %v1400_v48  ;;  %v2222_v54 = vpop.permute.xlu0 %2221  ;;  %v1403_v56 = vsel %vm588_vm4, %v2219_v5, %v2184_v44  ;;  %v2188_v57 = vunpack.i.l.bf16 %v2187_v47 }
 0x4bb   :  { %v2224_v58 = vunpack.i.h.bf16 %v2222_v54  ;;  %v2223_v59 = vunpack.i.l.bf16 %v2222_v54  ;;  %v1956_v60 = vpack.c.bf16 %v1403_v56, %v1402_v55 }
 0x4bc   :  { %v2192_v61 = vpop.permute.xlu1 %2191 }
 0x4bd   :  { %v1374_v62 = vsel %vm561_vm5, %v2188_v57, %v2223_v59  ;;  %v1375_v63 = vsel %vm561_vm5, %v2189_v53, %v2224_v58  ;;  %1580 = vmatprep.subr.bf16.mxu1 %v1956_v60  ;;  %v2194_v8 = vunpack.i.h.bf16 %v2192_v61  ;;  %v1376_v12 = vsel %vm561_vm5, %v2223_v59, %v2188_v57 }
 0x4be   :  { %v1953_v3 = vpack.c.bf16 %v1375_v63, %v1374_v62  ;;  %1581 = vmatpush1.bf16.msra.mxu1 %v1955_v52  ;;  %v2227_v11 = vpop.permute.xlu0 %2226  ;;  %v1377_v17 = vsel %vm561_vm5, %v2224_v58, %v2189_v53  ;;  %v2193_v18 = vunpack.i.l.bf16 %v2192_v61 }
 0x4bf   :  { %v2229_v24 = vunpack.i.h.bf16 %v2227_v11  ;;  %v2228_v25 = vunpack.i.l.bf16 %v2227_v11  ;;  %v1954_v26 = vpack.c.bf16 %v1377_v17, %v1376_v12 }
 0x4c0   :  { %v2197_v27 = vpop.permute.xlu1 %2196 }
 0x4c1   :  { %v1348_v28 = vsel %vm534_vm6, %v2193_v18, %v2228_v25  ;;  %v1349_v29 = vsel %vm534_vm6, %v2194_v8, %v2229_v24  ;;  %1582 = vmatprep.subr.bf16.mxu1 %v1954_v26  ;;  %v2199_v32 = vunpack.i.h.bf16 %v2197_v27  ;;  %v1350_v34 = vsel %vm534_vm6, %v2228_v25, %v2193_v18 }
 0x4c2   :  { %v1951_v31 = vpack.c.bf16 %v1349_v29, %v1348_v28  ;;  %1583 = vmatpush1.bf16.msra.mxu1 %v1953_v3  ;;  %v2232_v33 = vpop.permute.xlu0 %2231  ;;  %v1351_v35 = vsel %vm534_vm6, %v2229_v24, %v2194_v8  ;;  %v2198_v36 = vunpack.i.l.bf16 %v2197_v27 }
 0x4c3   :  { %v2234_v37 = vunpack.i.h.bf16 %v2232_v33  ;;  %v2233_v38 = vunpack.i.l.bf16 %v2232_v33  ;;  %v1952_v39 = vpack.c.bf16 %v1351_v35, %v1350_v34  ;;  %v2271_v33 = vld [vmem:[%s2798_s1 + $0x30] ss:$8 sps:$4 sm:$0xff]  }
 0x4c4   :  { %v2202_v40 = vpop.permute.xlu1 %2201 }
 0x4c5   :  { %v1322_v41 = vsel %vm206_vm3, %v2198_v36, %v2233_v38  ;;  %v1323_v45 = vsel %vm206_vm3, %v2199_v32, %v2234_v37  ;;  %1584 = vmatprep.subr.bf16.mxu1 %v1952_v39  ;;  %v2204_v43 = vunpack.i.h.bf16 %v2202_v40  ;;  %v1324_v16 = vsel %vm206_vm3, %v2233_v38, %v2198_v36 }
 0x4c6   :  { %v1949_v42 = vpack.c.bf16 %v1323_v45, %v1322_v41  ;;  %1585 = vmatpush1.bf16.msra.mxu1 %v1951_v31  ;;  %v2237_v15 = vpop.permute.xlu0 %2236  ;;  %v1325_v13 = vsel %vm206_vm3, %v2234_v37, %v2199_v32  ;;  %v2203_v14 = vunpack.i.l.bf16 %v2202_v40 }
 0x4c7   :  { %v2239_v50 = vunpack.i.h.bf16 %v2237_v15  ;;  %v2238_v19 = vunpack.i.l.bf16 %v2237_v15  ;;  %v1950_v46 = vpack.c.bf16 %v1325_v13, %v1324_v16 }
 0x4c8   :  { %v2207_v6 = vpop.permute.xlu1 %2206 }
 0x4c9   :  { %v1296_v7 = vsel %vm153_vm1, %v2203_v14, %v2238_v19  ;;  %v1297_v0 = vsel %vm153_vm1, %v2204_v43, %v2239_v50  ;;  %1586 = vmatprep.subr.bf16.mxu1 %v1950_v46  ;;  %v2209_v10 = vunpack.i.h.bf16 %v2207_v6  ;;  %v1298_v20 = vsel %vm153_vm1, %v2238_v19, %v2203_v14 }
 0x4ca   :  { %v1947_v1 = vpack.c.bf16 %v1297_v0, %v1296_v7  ;;  %1587 = vmatpush1.bf16.msra.mxu1 %v1949_v42  ;;  %v2242_v51 = vpop.permute.xlu0 %2241  ;;  %v1299_v21 = vsel %vm153_vm1, %v2239_v50, %v2204_v43  ;;  %v2208_v22 = vunpack.i.l.bf16 %v2207_v6 }
 0x4cb   :  { %v2244_v44 = vunpack.i.h.bf16 %v2242_v51  ;;  %v2243_v2 = vunpack.i.l.bf16 %v2242_v51  ;;  %v1948_v5 = vpack.c.bf16 %v1299_v21, %v1298_v20 }
 0x4cc   :  { %v2212_v23 = vpop.permute.xlu1 %2211 }
 0x4cd   :  { %v1270_v47 = vsel %vm455_vm7, %v2208_v22, %v2243_v2  ;;  %v1271_v48 = vsel %vm455_vm7, %v2209_v10, %v2244_v44  ;;  %1588 = vmatprep.subr.bf16.mxu1 %v1948_v5  ;;  %v2214_v52 = vunpack.i.h.bf16 %v2212_v23  ;;  %v1272_v54 = vsel %vm455_vm7, %v2243_v2, %v2208_v22 }
 0x4ce   :  { %v1945_v49 = vpack.c.bf16 %v1271_v48, %v1270_v47  ;;  %1589 = vmatpush1.bf16.msra.mxu1 %v1947_v1  ;;  %v2247_v53 = vpop.permute.xlu0 %2246  ;;  %v1273_v55 = vsel %vm455_vm7, %v2244_v44, %v2209_v10  ;;  %v2213_v56 = vunpack.i.l.bf16 %v2212_v23 }
 0x4cf   :  { %v2249_v57 = vunpack.i.h.bf16 %v2247_v53  ;;  %v2248_v58 = vunpack.i.l.bf16 %v2247_v53  ;;  %v1946_v59 = vpack.c.bf16 %v1273_v55, %v1272_v54 }
 0x4d0   :  { %v2252_v62 = vpop.permute.xlu1 %2251 }
 0x4d1   :  { %v1244_v60 = vsel %vm72_vm2, %v2213_v56, %v2248_v58  ;;  %v1245_v61 = vsel %vm72_vm2, %v2214_v52, %v2249_v57  ;;  %1590 = vmatprep.subr.bf16.mxu1 %v1946_v59  ;;  %v1246_v8 = vsel %vm72_vm2, %v2248_v58, %v2213_v56  ;;  %v1247_v11 = vsel %vm72_vm2, %v2249_v57, %v2214_v52 }
 0x4d2   :  { %v1943_v63 = vpack.c.bf16 %v1245_v61, %v1244_v60  ;;  %1591 = vmatpush1.bf16.msra.mxu1 %v1945_v49  ;;  %v2257_v3 = vpop.permute.xlu0 %2256  ;;  %v1944_v18 = vpack.c.bf16 %v1247_v11, %v1246_v8  ;;  %v2254_v24 = vunpack.i.h.bf16 %v2252_v62  ;;  %v2253_v25 = vunpack.i.l.bf16 %v2252_v62 }
 0x4d3   :  { %v2259_v12 = vunpack.i.h.bf16 %v2257_v3  ;;  %v2258_v17 = vunpack.i.l.bf16 %v2257_v3 }
 0x4d4   :  { %1592 = vmatprep.subr.bf16.mxu1 %v1944_v18 }
 0x4d5   :  { %v1428_v26 = vsel %vm615_vm8, %v2258_v17, %v2253_v25  ;;  %v1429_v27 = vsel %vm615_vm8, %v2259_v12, %v2254_v24  ;;  %v1426_v28 = vsel %vm615_vm8, %v2253_v25, %v2258_v17  ;;  %v1427_v29 = vsel %vm615_vm8, %v2254_v24, %v2259_v12 }
 0x4d6   :  { %1593 = vmatpush1.bf16.msra.mxu1 %v1943_v63  ;;  %v1958_v31 = vpack.c.bf16 %v1429_v27, %v1428_v26  ;;  %v1957_v32 = vpack.c.bf16 %v1427_v29, %v1426_v28 }
 0x4d7   :  { %1594 = vmatprep.subr.bf16.mxu1 %v2688_v4 }
 0x4da   :  { %1595 = vmatpush1.bf16.msra.mxu1 %v2690_v9 }
 0x4db   :  { %1610 = vmatprep.subr.bf16.mxu1 %v1958_v31 }
 0x4dd   :  { %v1471_v34 = vpop.permute.xlu1 %1470 }
 0x4de   :  { %1611 = vmatpush2.bf16.msra.mxu1 %v1957_v32 }
 0x4df   :  { %v1476_v39 = vpop.permute.xlu0 %1475 }
 0x4e1   :  { %1613 = vmatmul.mubr.bf16.vlgmr.msra.gmra.mxu1 %v2271_v33 }
 0x5a1   :  { %v1614_v35 = vpop.f32.mrf.mxu1 }
 0x5a2   :  { %v1615_v4 = vadd.f32 %v1614_v35, %v1471_v34 }
 0x5a3   :  { %v1616_v36 = vpop.f32.mrf.mxu1 }
 0x5a4   :  { %v1623_v37 = vmax.f32 %v1615_v4, 0.0  ;;  %v1617_v38 = vadd.f32 %v1616_v36, %v1471_v34 }
 0x5a5   :  { %v1618_v30 = vpop.f32.mrf.mxu1 }
 0x5a6   :  { %1627 = vst [vmem:[%s2800_s3] sm:$0xff] %v1623_v37  ;;  %v1624_v9 = vmax.f32 %v1617_v38, 0.0  ;;  %v1619_v40 = vadd.f32 %v1618_v30, %v1476_v39 }
 0x5a7   :  { %v1620_v41 = vpop.f32.mrf.mxu1 }
 0x5a8   :  { %1628 = vst [vmem:[%s2800_s3 + $0x8] sm:$0xff] %v1624_v9  ;;  %v1625_v45 = vmax.f32 %v1619_v40, 0.0  ;;  %v1621_v42 = vadd.f32 %v1620_v41, %v1476_v39 }
 0x5aa   :  { %1629 = vst [vmem:[%s2800_s3 + $0x10] sm:$0xff] %v1625_v45  ;;  %v1626_v43 = vmax.f32 %v1621_v42, 0.0 }
 0x5ac   :  { %1630 = vst [vmem:[%s2800_s3 + $0x18] sm:$0xff] %v1626_v43 }

</bundles_post_ra>
